<compile_context>
chip_gen: v5e
topology: v5e:2x2
jax: 0.10.0
libtpu: 0.0.40
codegen_flags: <defaults>
</compile_context>

<pallas_src>
import functools

import jax
import jax.numpy as jnp
from jax.experimental import pallas as pl
from jax.experimental.pallas import tpu as pltpu

EPS = 1e-5
LANE = 128
SUBLANE = 8


def _round_up(x, m):
    return (x + m - 1) // m * m


def _cdiv(a, b):
    return -(-a // b)


def _hw_defaults():
    """(vmem_limit_bytes, conv_row_target, bn_row_target) per TPU generation."""
    vmem = 64 * 1024 * 1024
    try:
        info = pltpu.get_tpu_info()
        for attr in ("vmem_capacity_bytes", "vmem_bytes", "vmem_size_bytes"):
            v = getattr(info, attr, None)
            if v:
                vmem = int(v)
                break
    except Exception:
        pass
    if vmem >= 100 * 1024 * 1024:            # v5e / v6e: 128 MiB VMEM
        return 96 * 1024 * 1024, 4096, 16384
    return 40 * 1024 * 1024, 2048, 8192      # v7x: 64 MiB per TensorCore


def _pick_bn_tile(nb, blk, target_rows):
    """Row tile for the BN pass: a multiple of blk dividing nb*blk, near the
    target, kept a multiple of 8 sublanes (else fall back to the full extent)."""
    cap = max(1, min(nb, max(1, target_rows // max(1, blk))))
    for k in range(cap, 0, -1):
        if nb % k == 0 and (k * blk) % SUBLANE == 0:
            return k * blk
    return nb * blk


# ---------------------------------------------------------------------------
# Kernel 1: conv as ONE K=9*cin_p MXU matmul + streamed BN statistics
# ---------------------------------------------------------------------------
def _conv_stats_kernel(xb_ref, w_ref, y_ref, stats_ref, *, width, th, h):
    # xb_ref   : (th+2, W+2, cin_p) bf16  one halo row-block of the input
    # w_ref    : (9*cin_p, c_pad)  bf16   taps stacked along K (t = dy*3+dx)
    # y_ref    : (th*W, c_pad)     bf16   pre-BN conv output rows
    # stats_ref: (2, c_pad)        f32    this block's [sum, sum_of_squares]
    cin = xb_ref.shape[-1]
    rows = th * width

    v = xb_ref[...]
    # im2col LHS built once per tile in VMEM: 9 shifted slices concatenated
    # along the lane axis -> a single K = 9*cin_p contraction on the MXU.
    taps = [v[dy:dy + th, dx:dx + width, :]
            for dy in range(3) for dx in range(3)]
    lhs = jnp.concatenate(taps, axis=-1).reshape(rows, 9 * cin)
    # Conv bias intentionally omitted (cancelled exactly by the batch-mean
    # subtraction of training-mode BatchNorm).
    acc = jnp.dot(lhs, w_ref[...], preferred_element_type=jnp.float32)

    y_ref[...] = acc.astype(y_ref.dtype)

    # Rows past the real image height (H rounded up to GH*th) must not
    # contribute to the BatchNorm statistics.
    j = pl.program_id(1)
    valid_rows = jnp.minimum(th, h - j * th) * width
    ridx = jax.lax.broadcasted_iota(jnp.int32, (rows, 1), 0)
    accm = jnp.where(ridx < valid_rows, acc, 0.0)
    ssum = jnp.sum(accm, axis=0, keepdims=True)
    ssq = jnp.sum(accm * accm, axis=0, keepdims=True)
    stats_ref[...] = jnp.concatenate([ssum, ssq], axis=0)


# ---------------------------------------------------------------------------
# Kernel 2: BatchNorm (folded scale/shift) + ReLU, lane-dense tiles
# ---------------------------------------------------------------------------
def _bn_relu_kernel(y_ref, scale_ref, shift_ref, o_ref):
    y = y_ref[...].astype(jnp.float32) * scale_ref[...] + shift_ref[...]
    o_ref[...] = jnp.maximum(y, 0.0).astype(o_ref.dtype)


# ---------------------------------------------------------------------------
# Blocked-halo layout: (N,H,W,C) -> (N*GH, th+2, W+2, C) overlapping row
# windows of the zero-padded image (H rounded up to GH*th).
# ---------------------------------------------------------------------------
def _blocked_halo(x_nhwc, th):
    n, h, w, c = x_nhwc.shape
    gh = _cdiv(h, th)
    hp = gh * th
    xp = jnp.pad(x_nhwc, ((0, 0), (1, hp - h + 1), (1, 1), (0, 0)))
    blocks = [xp[:, j * th:j * th + th + 2] for j in range(gh)]
    xb = jnp.stack(blocks, axis=1).reshape(n * gh, th + 2, w + 2, c)
    return xb, gh


# ---------------------------------------------------------------------------
# One gridded conv + statistics pallas_call
# ---------------------------------------------------------------------------
def _conv_stage(xb, w_packed, *, n, gh, th, h, w, vmem_limit):
    nb, _, wp2, cin_p = xb.shape
    kdim, c_pad = w_packed.shape
    rows = th * w

    cost = pl.CostEstimate(
        flops=2 * nb * rows * kdim * c_pad,
        transcendentals=0,
        bytes_accessed=(xb.size * 2 + w_packed.size * 2
                        + nb * rows * c_pad * 2 + nb * 2 * c_pad * 4))

    y_raw, stats = pl.pallas_call(
        functools.partial(_conv_stats_kernel, width=w, th=th, h=h),
        grid=(n, gh),
        in_specs=[
            pl.BlockSpec((None, th + 2, wp2, cin_p),
                         lambda i, j: (i * gh + j, 0, 0, 0)),
            pl.BlockSpec((kdim, c_pad), lambda i, j: (0, 0)),  # weights resident
        ],
        out_specs=[
            pl.BlockSpec((None, rows, c_pad), lambda i, j: (i * gh + j, 0, 0)),
            pl.BlockSpec((None, 2, c_pad), lambda i, j: (i * gh + j, 0, 0)),
        ],
        out_shape=[
            jax.ShapeDtypeStruct((nb, rows, c_pad), jnp.bfloat16),
            jax.ShapeDtypeStruct((nb, 2, c_pad), jnp.float32),
        ],
        compiler_params=pltpu.CompilerParams(
            dimension_semantics=("parallel", "parallel"),
            vmem_limit_bytes=vmem_limit),
        cost_estimate=cost,
    )(xb, w_packed)
    return y_raw, stats


def _fold_bn(stats, gamma, beta, m_real):
    # Training-mode BN folded into one per-channel scale/shift.  Padded
    # channels have gamma = beta = 0 so they stay exactly zero.
    # NOTE: E[x^2]-E[x]^2 in f32 can lose precision for very large batches
    # with mean >> std; fine at these sizes (partials are per-tile, f32).
    s = jnp.sum(stats[:, 0, :], axis=0)
    ss = jnp.sum(stats[:, 1, :], axis=0)
    mean = s / m_real
    var = jnp.maximum(ss / m_real - mean * mean, 0.0)   # biased variance
    inv_std = jax.lax.rsqrt(var + EPS)
    scale = gamma * inv_std
    shift = beta - mean * scale
    return scale, shift


# ---------------------------------------------------------------------------
# VGGBlock forward (public wrapper: NCHW in/out, like the PyTorch module)
# ---------------------------------------------------------------------------
def vgg_block(x_nchw, params, *, channels, row_tile=None, bn_rows=None):
    _, out_c = channels
    vmem_limit, conv_rows, bn_rows_default = _hw_defaults()
    if bn_rows is None:
        bn_rows = bn_rows_default

    n, cin, h, w = x_nchw.shape
    s1, s2 = params["s1"], params["s2"]
    cin_p1 = s1["w"].shape[0] // 9
    c_pad1 = s1["w"].shape[1]
    c_pad2 = s2["w"].shape[1]

    def pick_th():
        th = min(h, max(1, row_tile if row_tile is not None
                        else max(1, conv_rows // w)))
        gh = _cdiv(h, th)
        if n * gh < 2 and h > 1:   # keep >= 2 grid steps (v7x: 2 TensorCores)
            th = _cdiv(h, 2)
        return th

    # ---- stage 1 -----------------------------------------------------------
    x = jnp.transpose(x_nchw, (0, 2, 3, 1)).astype(jnp.bfloat16)   # NCHW->NHWC
    x = jnp.pad(x, ((0, 0), (0, 0), (0, 0), (0, cin_p1 - cin)))
    th1 = pick_th()
    xb1, gh1 = _blocked_halo(x, th1)
    y1_raw, stats1 = _conv_stage(xb1, s1["w"], n=n, gh=gh1, th=th1, h=h, w=w,
                                 vmem_limit=vmem_limit)
    m_real = n * h * w
    scale1, shift1 = _fold_bn(stats1, s1["gamma"], s1["beta"], m_real)

    # ---- stage-1 BN+ReLU fused into stage-2's halo repack (one XLA pass) ----
    y1 = y1_raw.reshape(n, gh1 * th1, w, c_pad1)[:, :h]
    y1 = jnp.maximum(y1.astype(jnp.float32) * scale1 + shift1, 0.0)
    y1 = y1.astype(jnp.bfloat16)

    # ---- stage 2 (consumes the full c_pad1-wide channels, no re-pad) --------
    th2 = pick_th()
    xb2, gh2 = _blocked_halo(y1, th2)
    y2_raw, stats2 = _conv_stage(xb2, s2["w"], n=n, gh=gh2, th=th2, h=h, w=w,
                                 vmem_limit=vmem_limit)
    scale2, shift2 = _fold_bn(stats2, s2["gamma"], s2["beta"], m_real)

    # ---- final BN + ReLU: memory-bound, lane-dense tiles ---------------------
    nb2 = n * gh2
    m_pad = nb2 * th2 * w
    y2_flat = y2_raw.reshape(m_pad, c_pad2)
    tm = _pick_bn_tile(nb2, th2 * w, bn_rows)
    out_flat = pl.pallas_call(
        _bn_relu_kernel,
        grid=(m_pad // tm,),
        in_specs=[pl.BlockSpec((tm, c_pad2), lambda i: (i, 0)),
                  pl.BlockSpec((1, c_pad2), lambda i: (0, 0)),
                  pl.BlockSpec((1, c_pad2), lambda i: (0, 0))],
        out_specs=pl.BlockSpec((tm, c_pad2), lambda i: (i, 0)),
        out_shape=jax.ShapeDtypeStruct((m_pad, c_pad2), jnp.float32),
        compiler_params=pltpu.CompilerParams(
            dimension_semantics=("parallel",),
            vmem_limit_bytes=vmem_limit),
    )(y2_flat, scale2[None, :], shift2[None, :])

    out = out_flat.reshape(n, gh2 * th2, w, c_pad2)[:, :h, :, :out_c]
    return jnp.transpose(out, (0, 3, 1, 2))                        # NHWC->NCHW


# ---------------------------------------------------------------------------
# Parameter preparation
# ---------------------------------------------------------------------------
def _prep_stage_params(w_pt, gamma, beta, cin_pad):
    cout, cin = int(w_pt.shape[0]), int(w_pt.shape[1])
    c_pad = _round_up(cout, LANE)
    # (Cout, Cin, 3, 3) -> (3, 3, Cin, Cout), pad per-tap, -> (9*cin_pad, c_pad)
    wt = jnp.transpose(w_pt, (2, 3, 1, 0))
    wt = jnp.pad(wt, ((0, 0), (0, 0), (0, cin_pad - cin), (0, c_pad - cout)))
    return {
        "w": wt.reshape(9 * cin_pad, c_pad).astype(jnp.bfloat16),
        "gamma": jnp.pad(gamma, (0, c_pad - cout)).astype(jnp.float32),
        "beta": jnp.pad(beta, (0, c_pad - cout)).astype(jnp.float32),
    }


def make_params(key, in_c, mid_c, out_c):
    ks = jax.random.split(key, 8)
    raw = {
        "w1_pt": 0.2 * jax.random.normal(ks[0], (mid_c, in_c, 3, 3), jnp.float32),
        "b1":    0.1 * jax.random.normal(ks[1], (mid_c,), jnp.float32),
        "g1":    1.0 + 0.1 * jax.random.normal(ks[2], (mid_c,), jnp.float32),
        "be1":   0.1 * jax.random.normal(ks[3], (mid_c,), jnp.float32),
        "w2_pt": 0.2 * jax.random.normal(ks[4], (out_c, mid_c, 3, 3), jnp.float32),
        "b2":    0.1 * jax.random.normal(ks[5], (out_c,), jnp.float32),
        "g2":    1.0 + 0.1 * jax.random.normal(ks[6], (out_c,), jnp.float32),
        "be2":   0.1 * jax.random.normal(ks[7], (out_c,), jnp.float32),
    }
    s1 = _prep_stage_params(raw["w1_pt"], raw["g1"], raw["be1"],
                            _round_up(in_c, SUBLANE))
    # Stage 2 consumes stage 1's full c_pad-wide output: cin_pad = c_pad1.
    s2 = _prep_stage_params(raw["w2_pt"], raw["g2"], raw["be2"],
                            s1["w"].shape[1])
    return {"s1": s1, "s2": s2}, raw


# ---------------------------------------------------------------------------
# Pure-JAX f32 reference (with conv bias, which training-mode BN cancels)
# ---------------------------------------------------------------------------
def vgg_block_ref(x_nchw, raw):
    def stage(x, w_pt, b, g, be):
        y = jax.lax.conv_general_dilated(
            x, w_pt, window_strides=(1, 1), padding=((1, 1), (1, 1)),
            dimension_numbers=("NCHW", "OIHW", "NCHW"),
            precision=jax.lax.Precision.HIGHEST)
        y = y + b[None, :, None, None]
        mean = jnp.mean(y, axis=(0, 2, 3), keepdims=True)
        var = jnp.mean(jnp.square(y - mean), axis=(0, 2, 3), keepdims=True)
        y = (y - mean) * jax.lax.rsqrt(var + EPS)
        y = y * g[None, :, None, None] + be[None, :, None, None]
        return jnp.maximum(y, 0.0)

    y = stage(x_nchw, raw["w1_pt"], raw["b1"], raw["g1"], raw["be1"])
    y = stage(y, raw["w2_pt"], raw["b2"], raw["g2"], raw["be2"])
    return y


if __name__ == "__main__":
    key = jax.random.PRNGKey(0)
    k_x, k_p = jax.random.split(key)

    N, IN_C, MID_C, OUT_C, H, W = 2, 4, 8, 8, 16, 16
    x = jax.random.normal(k_x, (N, IN_C, H, W), jnp.float32)
    params, raw = make_params(k_p, IN_C, MID_C, OUT_C)

    # row_tile=5 does NOT divide H=16: exercises the padded-row / masked-stats
    # path and a multi-step (2 x 4) pipelined conv grid at toy sizes; bn_rows
    # makes the final BN/ReLU pass a 4-step grid too.  Realistic shapes use
    # the per-generation auto-picked tiles.
    fwd = jax.jit(functools.partial(vgg_block, channels=(MID_C, OUT_C),
                                    row_tile=5, bn_rows=160))
    out = jax.block_until_ready(fwd(x, params))
    assert out.shape == (N, OUT_C, H, W), out.shape

    ref = jax.block_until_ready(vgg_block_ref(x, raw))
    max_err = float(jnp.max(jnp.abs(out - ref)))
    # bf16 matmuls + bf16 pre-BN intermediates vs f32 HIGHEST reference.
    assert jnp.allclose(out, ref, atol=7e-2, rtol=5e-2), max_err

    print("KERNEL_OK")
</pallas_src>

<mosaic_0001>
module attributes {stable_mosaic.version = 11 : i64} {
  func.func @_conv_stats_kernel(%arg0: i32, %arg1: i32, %arg2: memref<1x7x18x8xbf16, #tpu.memory_space<vmem>>, %arg3: memref<72x128xbf16, #tpu.memory_space<vmem>>, %arg4: memref<1x80x128xbf16, #tpu.memory_space<vmem>>, %arg5: memref<1x2x128xf32, #tpu.memory_space<vmem>>) attributes {dimension_semantics = [#tpu.dimension_semantics<parallel>, #tpu.dimension_semantics<parallel>], iteration_bounds = array<i64: 2, 4>, scalar_prefetch = 0 : i64, scratch_operands = 0 : i64, tpu.core_type = #tpu.core_type<tc>, window_params = [{transform_indices = @transform_0, window_bounds = array<i64: 1, 7, 18, 8>}, {pipeline_mode = #tpu.pipeline_mode<synchronous>, transform_indices = @transform_1, window_bounds = array<i64: 72, 128>}, {transform_indices = @transform_2, window_bounds = array<i64: 1, 80, 128>}, {transform_indices = @transform_3, window_bounds = array<i64: 1, 2, 128>}]} {
    %c0 = arith.constant 0 : index
    %c0_0 = arith.constant 0 : index
    %c0_1 = arith.constant 0 : index
    %c0_2 = arith.constant 0 : index
    %0 = vector.load %arg2[%c0, %c0_0, %c0_1, %c0_2] : memref<1x7x18x8xbf16, #tpu.memory_space<vmem>>, vector<1x7x18x8xbf16>
    %1 = vector.shape_cast %0 : vector<1x7x18x8xbf16> to vector<7x18x8xbf16>
    %2 = vector.extract_strided_slice %1 {offsets = [0, 0, 0], sizes = [5, 16, 8], strides = [1, 1, 1]} : vector<7x18x8xbf16> to vector<5x16x8xbf16>
    %3 = vector.extract_strided_slice %1 {offsets = [0, 1, 0], sizes = [5, 16, 8], strides = [1, 1, 1]} : vector<7x18x8xbf16> to vector<5x16x8xbf16>
    %4 = vector.extract_strided_slice %1 {offsets = [0, 2, 0], sizes = [5, 16, 8], strides = [1, 1, 1]} : vector<7x18x8xbf16> to vector<5x16x8xbf16>
    %5 = vector.extract_strided_slice %1 {offsets = [1, 0, 0], sizes = [5, 16, 8], strides = [1, 1, 1]} : vector<7x18x8xbf16> to vector<5x16x8xbf16>
    %6 = vector.extract_strided_slice %1 {offsets = [1, 1, 0], sizes = [5, 16, 8], strides = [1, 1, 1]} : vector<7x18x8xbf16> to vector<5x16x8xbf16>
    %7 = vector.extract_strided_slice %1 {offsets = [1, 2, 0], sizes = [5, 16, 8], strides = [1, 1, 1]} : vector<7x18x8xbf16> to vector<5x16x8xbf16>
    %8 = vector.extract_strided_slice %1 {offsets = [2, 0, 0], sizes = [5, 16, 8], strides = [1, 1, 1]} : vector<7x18x8xbf16> to vector<5x16x8xbf16>
    %9 = vector.extract_strided_slice %1 {offsets = [2, 1, 0], sizes = [5, 16, 8], strides = [1, 1, 1]} : vector<7x18x8xbf16> to vector<5x16x8xbf16>
    %10 = vector.extract_strided_slice %1 {offsets = [2, 2, 0], sizes = [5, 16, 8], strides = [1, 1, 1]} : vector<7x18x8xbf16> to vector<5x16x8xbf16>
    %11 = tpu.concatenate %2, %3, %4, %5, %6, %7, %8, %9, %10 in 2 : vector<5x16x8xbf16>, vector<5x16x8xbf16>, vector<5x16x8xbf16>, vector<5x16x8xbf16>, vector<5x16x8xbf16>, vector<5x16x8xbf16>, vector<5x16x8xbf16>, vector<5x16x8xbf16>, vector<5x16x8xbf16> -> vector<5x16x72xbf16>
    %12 = vector.shape_cast %11 : vector<5x16x72xbf16> to vector<80x72xbf16>
    %c0_3 = arith.constant 0 : index
    %c0_4 = arith.constant 0 : index
    %13 = vector.load %arg3[%c0_3, %c0_4] : memref<72x128xbf16, #tpu.memory_space<vmem>>, vector<72x128xbf16>
    %cst = arith.constant dense<0.000000e+00> : vector<80x128xf32>
    %14 = tpu.matmul %12, %13, %cst {dimension_numbers = #tpu.dot_dimension_numbers<[1], [0], [0], [1], [0, 0, 1, 1], [], []>} : vector<80x72xbf16>, vector<72x128xbf16>, vector<80x128xf32> -> vector<80x128xf32>
    %15 = arith.truncf %14 : vector<80x128xf32> to vector<80x128xbf16>
    %c0_5 = arith.constant 0 : index
    %c0_6 = arith.constant 0 : index
    %c0_7 = arith.constant 0 : index
    %16 = vector.load %arg4[%c0_5, %c0_6, %c0_7] : memref<1x80x128xbf16, #tpu.memory_space<vmem>>, vector<1x80x128xbf16>
    %17 = vector.shape_cast %16 : vector<1x80x128xbf16> to vector<80x128xbf16>
    %18 = vector.shape_cast %15 : vector<80x128xbf16> to vector<1x80x128xbf16>
    tpu.vector_store %arg4[%c0_5, %c0_6, %c0_7], %18 {strides = array<i32>} : memref<1x80x128xbf16, #tpu.memory_space<vmem>>, vector<1x80x128xbf16>,
    %c5_i32 = arith.constant 5 : i32
    %19 = arith.muli %arg1, %c5_i32 : i32
    %c16_i32 = arith.constant 16 : i32
    %20 = arith.subi %c16_i32, %19 : i32
    %c5_i32_8 = arith.constant 5 : i32
    %21 = arith.minsi %c5_i32_8, %20 : i32
    %c16_i32_9 = arith.constant 16 : i32
    %22 = arith.muli %21, %c16_i32_9 : i32
    %23 = tpu.iota {dimensions = array<i32: 0>} : vector<80x1xi32>
    %24 = vector.broadcast %22 : i32 to vector<80x1xi32>
    %25 = arith.cmpi slt, %23, %24 : vector<80x1xi32>
    %cst_10 = arith.constant 0.000000e+00 : f32
    %26 = vector.shape_cast %25 : vector<80x1xi1> to vector<80x1xi1>
    %27 = vector.broadcast %26 : vector<80x1xi1> to vector<80x128xi1>
    %28 = vector.broadcast %cst_10 : f32 to vector<80x128xf32>
    %29 = arith.select %27, %14, %28 : vector<80x128xi1>, vector<80x128xf32>
    %cst_11 = arith.constant dense<0.000000e+00> : vector<128xf32>
    %30 = vector.multi_reduction <add>, %29, %cst_11 [0] : vector<80x128xf32> to vector<128xf32>
    %31 = vector.shape_cast %30 : vector<128xf32> to vector<1x128xf32>
    %32 = arith.mulf %29, %29 : vector<80x128xf32>
    %cst_12 = arith.constant dense<0.000000e+00> : vector<128xf32>
    %33 = vector.multi_reduction <add>, %32, %cst_12 [0] : vector<80x128xf32> to vector<128xf32>
    %34 = vector.shape_cast %33 : vector<128xf32> to vector<1x128xf32>
    %35 = tpu.concatenate %31, %34 in 0 : vector<1x128xf32>, vector<1x128xf32> -> vector<2x128xf32>
    %c0_13 = arith.constant 0 : index
    %c0_14 = arith.constant 0 : index
    %c0_15 = arith.constant 0 : index
    %36 = vector.load %arg5[%c0_13, %c0_14, %c0_15] : memref<1x2x128xf32, #tpu.memory_space<vmem>>, vector<1x2x128xf32>
    %37 = vector.shape_cast %36 : vector<1x2x128xf32> to vector<2x128xf32>
    %38 = vector.shape_cast %35 : vector<2x128xf32> to vector<1x2x128xf32>
    tpu.vector_store %arg5[%c0_13, %c0_14, %c0_15], %38 {strides = array<i32>} : memref<1x2x128xf32, #tpu.memory_space<vmem>>, vector<1x2x128xf32>,
    return
  }
  func.func @transform_0(%arg0: i32, %arg1: i32) -> (i32, i32, i32, i32) {
    %c4_i32 = arith.constant 4 : i32
    %0 = arith.muli %arg0, %c4_i32 : i32
    %1 = arith.addi %0, %arg1 : i32
    %c0_i32 = arith.constant 0 : i32
    %c0_i32_0 = arith.constant 0 : i32
    %c0_i32_1 = arith.constant 0 : i32
    %c0_i32_2 = arith.constant 0 : i32
    return %1, %c0_i32, %c0_i32_0, %c0_i32_1 : i32, i32, i32, i32
  }
  func.func @transform_1(%arg0: i32, %arg1: i32) -> (i32, i32) {
    %c0_i32 = arith.constant 0 : i32
    %c0_i32_0 = arith.constant 0 : i32
    %c0_i32_1 = arith.constant 0 : i32
    return %c0_i32, %c0_i32_0 : i32, i32
  }
  func.func @transform_2(%arg0: i32, %arg1: i32) -> (i32, i32, i32) {
    %c4_i32 = arith.constant 4 : i32
    %0 = arith.muli %arg0, %c4_i32 : i32
    %1 = arith.addi %0, %arg1 : i32
    %c0_i32 = arith.constant 0 : i32
    %c0_i32_0 = arith.constant 0 : i32
    %c0_i32_1 = arith.constant 0 : i32
    return %1, %c0_i32, %c0_i32_0 : i32, i32, i32
  }
  func.func @transform_3(%arg0: i32, %arg1: i32) -> (i32, i32, i32) {
    %c4_i32 = arith.constant 4 : i32
    %0 = arith.muli %arg0, %c4_i32 : i32
    %1 = arith.addi %0, %arg1 : i32
    %c0_i32 = arith.constant 0 : i32
    %c0_i32_0 = arith.constant 0 : i32
    %c0_i32_1 = arith.constant 0 : i32
    return %1, %c0_i32, %c0_i32_0 : i32, i32, i32
  }
}

module attributes {stable_mosaic.version = 11 : i64} {
  func.func @_conv_stats_kernel(%arg0: i32, %arg1: i32, %arg2: memref<1x7x18x128xbf16, #tpu.memory_space<vmem>>, %arg3: memref<1152x128xbf16, #tpu.memory_space<vmem>>, %arg4: memref<1x80x128xbf16, #tpu.memory_space<vmem>>, %arg5: memref<1x2x128xf32, #tpu.memory_space<vmem>>) attributes {dimension_semantics = [#tpu.dimension_semantics<parallel>, #tpu.dimension_semantics<parallel>], iteration_bounds = array<i64: 2, 4>, scalar_prefetch = 0 : i64, scratch_operands = 0 : i64, tpu.core_type = #tpu.core_type<tc>, window_params = [{transform_indices = @transform_0, window_bounds = array<i64: 1, 7, 18, 128>}, {pipeline_mode = #tpu.pipeline_mode<synchronous>, transform_indices = @transform_1, window_bounds = array<i64: 1152, 128>}, {transform_indices = @transform_2, window_bounds = array<i64: 1, 80, 128>}, {transform_indices = @transform_3, window_bounds = array<i64: 1, 2, 128>}]} {
    %c0 = arith.constant 0 : index
    %c0_0 = arith.constant 0 : index
    %c0_1 = arith.constant 0 : index
    %c0_2 = arith.constant 0 : index
    %0 = vector.load %arg2[%c0, %c0_0, %c0_1, %c0_2] : memref<1x7x18x128xbf16, #tpu.memory_space<vmem>>, vector<1x7x18x128xbf16>
    %1 = vector.shape_cast %0 : vector<1x7x18x128xbf16> to vector<7x18x128xbf16>
    %2 = vector.extract_strided_slice %1 {offsets = [0, 0, 0], sizes = [5, 16, 128], strides = [1, 1, 1]} : vector<7x18x128xbf16> to vector<5x16x128xbf16>
    %3 = vector.extract_strided_slice %1 {offsets = [0, 1, 0], sizes = [5, 16, 128], strides = [1, 1, 1]} : vector<7x18x128xbf16> to vector<5x16x128xbf16>
    %4 = vector.extract_strided_slice %1 {offsets = [0, 2, 0], sizes = [5, 16, 128], strides = [1, 1, 1]} : vector<7x18x128xbf16> to vector<5x16x128xbf16>
    %5 = vector.extract_strided_slice %1 {offsets = [1, 0, 0], sizes = [5, 16, 128], strides = [1, 1, 1]} : vector<7x18x128xbf16> to vector<5x16x128xbf16>
    %6 = vector.extract_strided_slice %1 {offsets = [1, 1, 0], sizes = [5, 16, 128], strides = [1, 1, 1]} : vector<7x18x128xbf16> to vector<5x16x128xbf16>
    %7 = vector.extract_strided_slice %1 {offsets = [1, 2, 0], sizes = [5, 16, 128], strides = [1, 1, 1]} : vector<7x18x128xbf16> to vector<5x16x128xbf16>
    %8 = vector.extract_strided_slice %1 {offsets = [2, 0, 0], sizes = [5, 16, 128], strides = [1, 1, 1]} : vector<7x18x128xbf16> to vector<5x16x128xbf16>
    %9 = vector.extract_strided_slice %1 {offsets = [2, 1, 0], sizes = [5, 16, 128], strides = [1, 1, 1]} : vector<7x18x128xbf16> to vector<5x16x128xbf16>
    %10 = vector.extract_strided_slice %1 {offsets = [2, 2, 0], sizes = [5, 16, 128], strides = [1, 1, 1]} : vector<7x18x128xbf16> to vector<5x16x128xbf16>
    %11 = tpu.concatenate %2, %3, %4, %5, %6, %7, %8, %9, %10 in 2 : vector<5x16x128xbf16>, vector<5x16x128xbf16>, vector<5x16x128xbf16>, vector<5x16x128xbf16>, vector<5x16x128xbf16>, vector<5x16x128xbf16>, vector<5x16x128xbf16>, vector<5x16x128xbf16>, vector<5x16x128xbf16> -> vector<5x16x1152xbf16>
    %12 = vector.shape_cast %11 : vector<5x16x1152xbf16> to vector<80x1152xbf16>
    %c0_3 = arith.constant 0 : index
    %c0_4 = arith.constant 0 : index
    %13 = vector.load %arg3[%c0_3, %c0_4] : memref<1152x128xbf16, #tpu.memory_space<vmem>>, vector<1152x128xbf16>
    %cst = arith.constant dense<0.000000e+00> : vector<80x128xf32>
    %14 = tpu.matmul %12, %13, %cst {dimension_numbers = #tpu.dot_dimension_numbers<[1], [0], [0], [1], [0, 0, 1, 1], [], []>} : vector<80x1152xbf16>, vector<1152x128xbf16>, vector<80x128xf32> -> vector<80x128xf32>
    %15 = arith.truncf %14 : vector<80x128xf32> to vector<80x128xbf16>
    %c0_5 = arith.constant 0 : index
    %c0_6 = arith.constant 0 : index
    %c0_7 = arith.constant 0 : index
    %16 = vector.load %arg4[%c0_5, %c0_6, %c0_7] : memref<1x80x128xbf16, #tpu.memory_space<vmem>>, vector<1x80x128xbf16>
    %17 = vector.shape_cast %16 : vector<1x80x128xbf16> to vector<80x128xbf16>
    %18 = vector.shape_cast %15 : vector<80x128xbf16> to vector<1x80x128xbf16>
    tpu.vector_store %arg4[%c0_5, %c0_6, %c0_7], %18 {strides = array<i32>} : memref<1x80x128xbf16, #tpu.memory_space<vmem>>, vector<1x80x128xbf16>,
    %c5_i32 = arith.constant 5 : i32
    %19 = arith.muli %arg1, %c5_i32 : i32
    %c16_i32 = arith.constant 16 : i32
    %20 = arith.subi %c16_i32, %19 : i32
    %c5_i32_8 = arith.constant 5 : i32
    %21 = arith.minsi %c5_i32_8, %20 : i32
    %c16_i32_9 = arith.constant 16 : i32
    %22 = arith.muli %21, %c16_i32_9 : i32
    %23 = tpu.iota {dimensions = array<i32: 0>} : vector<80x1xi32>
    %24 = vector.broadcast %22 : i32 to vector<80x1xi32>
    %25 = arith.cmpi slt, %23, %24 : vector<80x1xi32>
    %cst_10 = arith.constant 0.000000e+00 : f32
    %26 = vector.shape_cast %25 : vector<80x1xi1> to vector<80x1xi1>
    %27 = vector.broadcast %26 : vector<80x1xi1> to vector<80x128xi1>
    %28 = vector.broadcast %cst_10 : f32 to vector<80x128xf32>
    %29 = arith.select %27, %14, %28 : vector<80x128xi1>, vector<80x128xf32>
    %cst_11 = arith.constant dense<0.000000e+00> : vector<128xf32>
    %30 = vector.multi_reduction <add>, %29, %cst_11 [0] : vector<80x128xf32> to vector<128xf32>
    %31 = vector.shape_cast %30 : vector<128xf32> to vector<1x128xf32>
    %32 = arith.mulf %29, %29 : vector<80x128xf32>
    %cst_12 = arith.constant dense<0.000000e+00> : vector<128xf32>
    %33 = vector.multi_reduction <add>, %32, %cst_12 [0] : vector<80x128xf32> to vector<128xf32>
    %34 = vector.shape_cast %33 : vector<128xf32> to vector<1x128xf32>
    %35 = tpu.concatenate %31, %34 in 0 : vector<1x128xf32>, vector<1x128xf32> -> vector<2x128xf32>
    %c0_13 = arith.constant 0 : index
    %c0_14 = arith.constant 0 : index
    %c0_15 = arith.constant 0 : index
    %36 = vector.load %arg5[%c0_13, %c0_14, %c0_15] : memref<1x2x128xf32, #tpu.memory_space<vmem>>, vector<1x2x128xf32>
    %37 = vector.shape_cast %36 : vector<1x2x128xf32> to vector<2x128xf32>
    %38 = vector.shape_cast %35 : vector<2x128xf32> to vector<1x2x128xf32>
    tpu.vector_store %arg5[%c0_13, %c0_14, %c0_15], %38 {strides = array<i32>} : memref<1x2x128xf32, #tpu.memory_space<vmem>>, vector<1x2x128xf32>,
    return
  }
  func.func @transform_0(%arg0: i32, %arg1: i32) -> (i32, i32, i32, i32) {
    %c4_i32 = arith.constant 4 : i32
    %0 = arith.muli %arg0, %c4_i32 : i32
    %1 = arith.addi %0, %arg1 : i32
    %c0_i32 = arith.constant 0 : i32
    %c0_i32_0 = arith.constant 0 : i32
    %c0_i32_1 = arith.constant 0 : i32
    %c0_i32_2 = arith.constant 0 : i32
    return %1, %c0_i32, %c0_i32_0, %c0_i32_1 : i32, i32, i32, i32
  }
  func.func @transform_1(%arg0: i32, %arg1: i32) -> (i32, i32) {
    %c0_i32 = arith.constant 0 : i32
    %c0_i32_0 = arith.constant 0 : i32
    %c0_i32_1 = arith.constant 0 : i32
    return %c0_i32, %c0_i32_0 : i32, i32
  }
  func.func @transform_2(%arg0: i32, %arg1: i32) -> (i32, i32, i32) {
    %c4_i32 = arith.constant 4 : i32
    %0 = arith.muli %arg0, %c4_i32 : i32
    %1 = arith.addi %0, %arg1 : i32
    %c0_i32 = arith.constant 0 : i32
    %c0_i32_0 = arith.constant 0 : i32
    %c0_i32_1 = arith.constant 0 : i32
    return %1, %c0_i32, %c0_i32_0 : i32, i32, i32
  }
  func.func @transform_3(%arg0: i32, %arg1: i32) -> (i32, i32, i32) {
    %c4_i32 = arith.constant 4 : i32
    %0 = arith.muli %arg0, %c4_i32 : i32
    %1 = arith.addi %0, %arg1 : i32
    %c0_i32 = arith.constant 0 : i32
    %c0_i32_0 = arith.constant 0 : i32
    %c0_i32_1 = arith.constant 0 : i32
    return %1, %c0_i32, %c0_i32_0 : i32, i32, i32
  }
}

module attributes {stable_mosaic.version = 11 : i64} {
  func.func @_bn_relu_kernel(%arg0: i32, %arg1: memref<160x128xbf16, #tpu.memory_space<vmem>>, %arg2: memref<1x128xf32, #tpu.memory_space<vmem>>, %arg3: memref<1x128xf32, #tpu.memory_space<vmem>>, %arg4: memref<160x128xf32, #tpu.memory_space<vmem>>) attributes {dimension_semantics = [#tpu.dimension_semantics<parallel>], iteration_bounds = array<i64: 4>, scalar_prefetch = 0 : i64, scratch_operands = 0 : i64, tpu.core_type = #tpu.core_type<tc>, window_params = [{transform_indices = @transform_0, window_bounds = array<i64: 160, 128>}, {pipeline_mode = #tpu.pipeline_mode<synchronous>, transform_indices = @transform_1, window_bounds = array<i64: 1, 128>}, {pipeline_mode = #tpu.pipeline_mode<synchronous>, transform_indices = @transform_2, window_bounds = array<i64: 1, 128>}, {transform_indices = @transform_3, window_bounds = array<i64: 160, 128>}]} {
    %c0 = arith.constant 0 : index
    %c0_0 = arith.constant 0 : index
    %0 = vector.load %arg1[%c0, %c0_0] : memref<160x128xbf16, #tpu.memory_space<vmem>>, vector<160x128xbf16>
    %1 = arith.extf %0 : vector<160x128xbf16> to vector<160x128xf32>
    %c0_1 = arith.constant 0 : index
    %c0_2 = arith.constant 0 : index
    %2 = vector.load %arg2[%c0_1, %c0_2] : memref<1x128xf32, #tpu.memory_space<vmem>>, vector<1x128xf32>
    %3 = vector.broadcast %2 : vector<1x128xf32> to vector<160x128xf32>
    %4 = arith.mulf %1, %3 : vector<160x128xf32>
    %c0_3 = arith.constant 0 : index
    %c0_4 = arith.constant 0 : index
    %5 = vector.load %arg3[%c0_3, %c0_4] : memref<1x128xf32, #tpu.memory_space<vmem>>, vector<1x128xf32>
    %6 = vector.broadcast %5 : vector<1x128xf32> to vector<160x128xf32>
    %7 = arith.addf %4, %6 : vector<160x128xf32>
    %cst = arith.constant 0.000000e+00 : f32
    %8 = vector.broadcast %cst : f32 to vector<160x128xf32>
    %9 = arith.maximumf %7, %8 : vector<160x128xf32>
    %c0_5 = arith.constant 0 : index
    %c0_6 = arith.constant 0 : index
    %10 = vector.load %arg4[%c0_5, %c0_6] : memref<160x128xf32, #tpu.memory_space<vmem>>, vector<160x128xf32>
    tpu.vector_store %arg4[%c0_5, %c0_6], %9 {strides = array<i32>} : memref<160x128xf32, #tpu.memory_space<vmem>>, vector<160x128xf32>,
    return
  }
  func.func @transform_0(%arg0: i32) -> (i32, i32) {
    %c0_i32 = arith.constant 0 : i32
    %c0_i32_0 = arith.constant 0 : i32
    return %arg0, %c0_i32 : i32, i32
  }
  func.func @transform_1(%arg0: i32) -> (i32, i32) {
    %c0_i32 = arith.constant 0 : i32
    %c0_i32_0 = arith.constant 0 : i32
    %c0_i32_1 = arith.constant 0 : i32
    return %c0_i32, %c0_i32_0 : i32, i32
  }
  func.func @transform_2(%arg0: i32) -> (i32, i32) {
    %c0_i32 = arith.constant 0 : i32
    %c0_i32_0 = arith.constant 0 : i32
    %c0_i32_1 = arith.constant 0 : i32
    return %c0_i32, %c0_i32_0 : i32, i32
  }
  func.func @transform_3(%arg0: i32) -> (i32, i32) {
    %c0_i32 = arith.constant 0 : i32
    %c0_i32_0 = arith.constant 0 : i32
    return %arg0, %c0_i32 : i32, i32
  }
}

</mosaic_0001>

<bundles_post_ra>
// kernel: vgg_block.3
= control target key start
LH: loop header
LB: loop body
LE: loop exit
PB: predicated region body
PF: predicated region fallthrough
CT: control target
= control target key end

     0   :  { %s1138_s12 = smov 0   ;;  %s1140_s13 = smov 0   ;;  %s1409_s0 = inlined_call_operand.vmem [shape: bf16[8,7,18,8], index: 0, kind: input, shape index: {}]   ;;  %s1410_s1 = inlined_call_operand.vmem [shape: bf16[72,128], index: 1, kind: input, shape index: {}]   ;;  %s1411_s2 = inlined_call_operand.vmem [shape: bf16[8,80,128], index: 2, kind: output, shape index: {0}]   ;;  %s1412_s3 = inlined_call_operand.vmem [shape: f32[8,2,128], index: 3, kind: output, shape index: {1}]  }
   0x1   :  { %s1142_s14 = smov 0   ;;  %s1144_s15 = smov 0  }
   0x2   :  { %s1146_s16 = smov 0  }
   0x3 LB: > { %s23_s17 = sadd.s32 1, %s1100_s14  ;;  %s26_s18 = sadd.s32 1, %s1104_s15  ;;  %s1108_s16 = sphi %s1146_s16, %s14_s16   ;;  %s1104_s15 = sphi %s1144_s15, %s1416_s15   ;;  %s1100_s14 = sphi %s1142_s14, %s1415_s14   ;;  %s1096_s13 = sphi %s1140_s13, %s1414_s13   ;;  %s1092_s12 = sphi %s1138_s12, %s1413_s12  }
   0x4   : > { %p24_p0 = scmp.ge.s32.totalorder %s23_s17, 4  ;;  %p906_p1 = scmp.ge.s32.totalorder %s1108_s16, 1 }
   0x5   : > { %p168_p2 = scmp.lt.s32.totalorder %s1108_s16, 9 }
   0x6   : > { %s1418_s17 = smov (%p24_p0, %s23_s17), 0  ;;  %s1420_s18 = smov (!%p24_p0, %s26_s18), %s1104_s15 }
   0x7   : > { %p169_p3 = pnand %p906_p1, %p168_p2  ;;  %p28_p4 = scmp.ge.s32.totalorder %s1420_s18, 2 }
   0x8   : > { %s907_s19 = sshll.u32 (!%p169_p3), %s1096_s13, 2  ;;  %s1110_s25 = smov (!%p169_p3), 24  }
   0x9   : > { %s1422_s18 = smov (%p28_p4, %s1420_s18), 0  ;;  %172 = sbr.rel (%p169_p3) target bundleno = 405 (0x195), region = 28 }
   0xa   : > { %s203_s20 = sadd.s32 (!%p169_p3), %s1092_s12, %s907_s19  ;;  %s1111_s26 = smov (!%p169_p3), 48  }
   0xb   : > { %p204_p5 = scmp.lt.s32.totalorder (!%p169_p3), %s203_s20, 7  ;;  %s1112_s27 = smov (!%p169_p3), 16  }
   0xc   : > { %s1113_s28 = smov (!%p169_p3), 32   ;;  %s1114_s29 = smov (!%p169_p3), 40  }
   0xd   : > { %s1115_s30 = smov (!%p169_p3), 8   ;;  %s1116_s4 = smov (!%p169_p3), 56  }
   0xe   : > { %s1424_s20 = smov (!%p204_p5, %s203_s20), 7  ;;  %vm361_vm0 = vcmask 1046528   ;;  %vm290_vm1 = vsmask.f32 7424  ;;  %s1117_s5 = smov 64   ;;  %vm628_vm2 = vcmask 1043456  }
   0xf   : > { %s1020_s21 = smul.u32 84, %s1424_s20  ;;  %vm493_vm3 = vcmask 64512   ;;  %vm504_vm4 = vcmask 130048   ;;  %vm515_vm5 = vcmask 195584   ;;  %vm526_vm6 = vcmask 261120  }
  0x10   : > { %vm537_vm7 = vcmask 326656   ;;  %vm548_vm8 = vcmask 392192   ;;  %vm559_vm9 = vcmask 457728   ;;  %vm570_vm10 = vcmask 523264   ;;  %s1021_s23 = smul.u32 40, %s1424_s20 }
  0x11   : > { %s1177_s24 = scalar_lea.vmem %s1409_s0, %s1020_s21  ;;  %vm617_vm11 = vcmask 588800  }
  0x12   : > { %v1180_v0 = vld [vmem:[%s1177_s24 + $0x30] sm:$0xff]  ;;  %v1183_v1 = vld [vmem:[%s1177_s24 + $0x24] sm:$0xff]  ;;  %v240_v2 = vld [vmem:[%s1177_s24 + $0x2c] sm:$0x1] }
  0x13   : > { %v283_v3 = vunpack.c.l.b16 %v240_v2  ;;  %v1187_v4 = vld [vmem:[%s1177_s24 + $0x3c] sm:$0xff]  ;;  %v243_v5 = vld [vmem:[%s1177_s24 + $0x38] sm:$0x1]  ;;  %v246_v6 = vld [vmem:[%s1177_s24 + $0x44] sm:$0x1]  ;;  %398 = vrot.lane.b32.xlu1 %v1180_v0, %s1110_s25  ;;  %v340_v8 = vshrl.u32 %v1180_v0, 16 }
  0x14   : > { %v284_v7 = vunpack.c.l.b16 %v243_v5  ;;  %v342_v9 = vshll.u32 %v1180_v0, 16  ;;  %v371_v11 = vrot.slane %v1183_v1, 1  ;;  %451 = vrot.lane.b32.xlu2 %v1187_v4, %s1111_s26  ;;  %v328_v12 = vshrl.u32 %v1183_v1, 16  ;;  %v1202_v18 = vld [vmem:[%s1177_s24] sm:$0xff]  ;;  %v231_v23 = vld [vmem:[%s1177_s24 + $0x8] sm:$0x1] }
  0x15   : > { %v288_v10 = vpack.c.b16 %v283_v3, %v283_v3  ;;  %v330_v13 = vshll.u32 %v1183_v1, 16  ;;  %v374_v16 = vrot.slane %v1180_v0, 1  ;;  %v403_v17 = vunpack.c.l.b16 %v246_v6  ;;  %v237_v31 = vld [vmem:[%s1177_s24 + $0x20] sm:$0x1]  ;;  %v1220_v36 = vld [vmem:[%s1177_s24 + $0x18] sm:$0xff]  ;;  %v1242_v59 = vld [vmem:[%s1177_s24 + $0xc] sm:$0xff] }
  0x16   : > { %v289_v14 = vpack.c.b16 %v284_v7, %v284_v7  ;;  %v344_v15 = vrot.slane %v342_v9, 1  ;;  %v408_v22 = vshll.u32 %v1187_v4, 16  ;;  %v406_v29 = vshrl.u32 %v1187_v4, 16  ;;  %v234_v53 = vld [vmem:[%s1177_s24 + $0x14] sm:$0x1] }
  0x17   : > { %v372_v19 = vrot.slane %v288_v10, 1  ;;  %v332_v20 = vrot.slane %v330_v13, 1  ;;  %v335_v21 = vshll.u32 %v288_v10, 16  ;;  %v1206_v27 = vpack.c.b16 %v403_v17, %v403_v17 }
  0x18   : > { %v345_v24 = vor.u32 %v344_v15, %v340_v8  ;;  %v347_v25 = vshll.u32 %v289_v14, 16  ;;  %v375_v26 = vrot.slane %v289_v14, 1  ;;  %v410_v30 = vrot.slane %v408_v22, 1 }
  0x19   : > { %v1209_v28 = vsel %vm361_vm0, %v371_v11, %v372_v19  ;;  %v413_v34 = vshll.u32 %v1206_v27, 16  ;;  %v280_v35 = vunpack.c.l.b16 %v231_v23  ;;  %v333_v37 = vor.u32 %v332_v20, %v328_v12 }
  0x1a   : > { %383 = vrot.lane.b32.xlu0 %v1209_v28, %s1112_s27  ;;  %v349_v32 = vrot.slane %v347_v25, 1  ;;  %v1216_v33 = vsel %vm361_vm0, %v374_v16, %v375_v26  ;;  %v337_v38 = vrot.slane %v335_v21, 1  ;;  %v294_v39 = vshll.u32 %v1202_v18, 16  ;;  %v971_v26 = vld [vmem:[%s1177_s24 + $0x48] sm:$0xff] }
  0x1b   : > { %v285_v41 = vpack.c.b16 %v280_v35, %v280_v35  ;;  %v282_v42 = vunpack.c.l.b16 %v237_v31  ;;  %v411_v43 = vor.u32 %v410_v30, %v406_v29  ;;  %v415_v44 = vrot.slane %v413_v34, 1  ;;  %v589_v29 = vld [vmem:[%s1410_s1 + $0x20] sm:$0xf] }
  0x1c   : > { %v1224_v40 = vsel %vm290_vm1, %v345_v24, %v349_v32  ;;  %436 = vrot.lane.b32.xlu2 %v1216_v33, %s1114_s29  ;;  %v318_v46 = vshll.u32 %v1220_v36, 16  ;;  %v362_v47 = vrot.slane %v1202_v18, 1  ;;  %v338_v49 = vsel %vm290_vm1, %v333_v37, %v337_v38  ;;  %v249_v24 = vld [vmem:[%s1177_s24 + $0x50] sm:$0x1] }
  0x1d   : > { %423 = vrot.lane.b32.xlu1 %v1224_v40, %s1113_s28  ;;  %v287_v45 = vpack.c.b16 %v282_v42, %v282_v42  ;;  %v363_v48 = vrot.slane %v285_v41, 1  ;;  %v292_v50 = vshrl.u32 %v1202_v18, 16  ;;  %v296_v51 = vrot.slane %v294_v39, 1 }
  0x1e   : > { %v299_v52 = vshll.u32 %v285_v41, 16  ;;  %v1236_v54 = vsel %vm290_vm1, %v411_v43, %v415_v44  ;;  %v316_v55 = vshrl.u32 %v1220_v36, 16  ;;  %v320_v56 = vrot.slane %v318_v46, 1  ;;  %v973_v44 = vld [vmem:[%s1410_s1 + $0x8] sm:$0xff]  ;;  %v972_v46 = vld [vmem:[%s1410_s1] sm:$0xff] }
  0x1f   : > { %v323_v57 = vshll.u32 %v287_v45, 16  ;;  %v364_v58 = vsel %vm361_vm0, %v362_v47, %v363_v48  ;;  %v281_v60 = vunpack.c.l.b16 %v234_v53  ;;  %v297_v61 = vor.u32 %v296_v51, %v292_v50 }
  0x20   : > { %v301_v62 = vrot.slane %v299_v52, 1  ;;  %v321_v63 = vor.u32 %v320_v56, %v316_v55  ;;  %v306_v5 = vshll.u32 %v1242_v59, 16  ;;  %v304_v8 = vshrl.u32 %v1242_v59, 16 }
  0x21   : > { %v325_v2 = vrot.slane %v323_v57, 1  ;;  %v286_v3 = vpack.c.b16 %v281_v60, %v281_v60  ;;  %v427_v11 = vrot.slane %v1187_v4, 1  ;;  %v428_v12 = vrot.slane %v1206_v27, 1 }
  0x22   : > { %357 = vrot.lane.b32.xlu0 %v338_v49, %s1115_s30  ;;  %v302_v6 = vsel %vm290_vm1, %v297_v61, %v301_v62  ;;  %v308_v9 = vrot.slane %v306_v5, 1  ;;  %v368_v17 = vrot.slane %v1220_v36, 1  ;;  %v369_v19 = vrot.slane %v287_v45, 1 }
  0x23   : > { %v326_v7 = vsel %vm290_vm1, %v321_v63, %v325_v2  ;;  %v311_v10 = vshll.u32 %v286_v3, 16  ;;  %v429_v15 = vsel %vm361_vm0, %v427_v11, %v428_v12  ;;  %v365_v20 = vrot.slane %v1242_v59, 1 }
  0x24   : > { %377 = vrot.lane.b32.xlu2 %v364_v58, %s1112_s27  ;;  %v309_v13 = vor.u32 %v308_v9, %v304_v8  ;;  %v366_v21 = vrot.slane %v286_v3, 1  ;;  %v370_v22 = vsel %vm361_vm0, %v368_v17, %v369_v19  ;;  %v456_v25 = vunpack.c.l.b16 %v249_v24 }
  0x25   : > { %476 = vrot.lane.b32.xlu1 %v1236_v54, %s1116_s4  ;;  %v313_v14 = vrot.slane %v311_v10, 1  ;;  %v461_v30 = vshll.u32 %v971_v26, 16  ;;  %v607_v31 = vunpack.c.l.b16 %v589_v29  ;;  %v459_v32 = vshrl.u32 %v971_v26, 16 }
  0x26   : > { %v367_v23 = vsel %vm361_vm0, %v365_v20, %v366_v21  ;;  %v457_v27 = vpack.c.b16 %v456_v25, %v456_v25  ;;  %v480_v41 = vrot.slane %v971_v26, 1 }
  0x27   : > { %v314_v16 = vsel %vm290_vm1, %v309_v13, %v313_v14  ;;  %v612_v35 = vpack.c.b16 %v607_v31, %v607_v31 }
  0x28   : > { %v466_v34 = vshll.u32 %v457_v27, 16  ;;  %v481_v42 = vrot.slane %v457_v27, 1 }
  0x29   : > { %v630_v38 = vsel %vm628_vm2, %v612_v35, 0 }
  0x2a   : > { %351 = vrot.lane.b32.xlu0 %v302_v6, %s1115_s30  ;;  %1007 = vmatpush.bf16.msra.mxu3 %v630_v38  ;;  %v482_v45 = vsel %vm361_vm0, %v480_v41, %v481_v42 }
  0x2b   : > { %635 = vmatpush.bf16.msra.mxu0 %v630_v38  ;;  %1006 = vmatpush.bf16.msra.mxu2 %v630_v38 }
  0x2c   : > { %392 = vrot.lane.b32.xlu2 %v1242_v59, %s1110_s25  ;;  %1005 = vmatpush.bf16.msra.mxu1 %v630_v38 }
  0x2d   : > { %355 = vrot.lane.b32.xlu1 %v326_v7, %s1115_s30 }
  0x32   : > { %489 = vrot.lane.b32.xlu0 %v429_v15, %s1117_s5 }
  0x34   : > { %353 = vrot.lane.b32.xlu2 %v314_v16, %s1115_s30 }
  0x35   : > { %417 = vrot.lane.b32.xlu1 %v314_v16, %s1113_s28 }
  0x3a   : > { %381 = vrot.lane.b32.xlu0 %v370_v22, %s1112_s27 }
  0x3c   : > { %379 = vrot.lane.b32.xlu2 %v367_v23, %s1112_s27 }
  0x3d   : > { %430 = vrot.lane.b32.xlu1 %v367_v23, %s1114_s29 }
  0x42   : > { %396 = vrot.lane.b32.xlu0 %v1183_v1, %s1110_s25 }
  0x44   : > { %394 = vrot.lane.b32.xlu2 %v1220_v36, %s1110_s25 }
  0x45   : > { %445 = vrot.lane.b32.xlu1 %v1220_v36, %s1111_s26 }
  0x4a   : > { %421 = vrot.lane.b32.xlu0 %v338_v49, %s1113_s28 }
  0x4c   : > { %419 = vrot.lane.b32.xlu2 %v326_v7, %s1113_s28 }
  0x4d   : > { %470 = vrot.lane.b32.xlu1 %v326_v7, %s1116_s4 }
  0x52   : > { %434 = vrot.lane.b32.xlu0 %v1209_v28, %s1114_s29 }
  0x54   : > { %432 = vrot.lane.b32.xlu2 %v370_v22, %s1114_s29 }
  0x55   : > { %483 = vrot.lane.b32.xlu1 %v370_v22, %s1117_s5 }
  0x5a   : > { %449 = vrot.lane.b32.xlu0 %v1180_v0, %s1111_s26 }
  0x5c   : > { %487 = vrot.lane.b32.xlu2 %v1216_v33, %s1117_s5 }
  0x5d   : > { %447 = vrot.lane.b32.xlu1 %v1183_v1, %s1111_s26 }
  0x62   : > { %474 = vrot.lane.b32.xlu0 %v1224_v40, %s1116_s4 }
  0x64   : > { %385 = vrot.lane.b32.xlu2 %v1216_v33, %s1112_s27  ;;  %v463_v33 = vrot.slane %v461_v30, 1  ;;  %s686_s27 = smul.u32 5, %s1092_s12  ;;  %s912_s12 = sshll.u32 %s1424_s20, 1 }
  0x65   : > { %472 = vrot.lane.b32.xlu1 %v338_v49, %s1116_s4 }
  0x66   : > { %v464_v37 = vor.u32 %v463_v33, %v459_v32 }
  0x6a   : > { %359 = vrot.lane.b32.xlu0 %v1224_v40, %s1115_s30  ;;  %v975_v40 = vld [vmem:[%s1410_s1 + $0x18] sm:$0xff] }
  0x6b   : > { %1010 = vmatpush.bf16.msra.mxu3 %v975_v40  ;;  %636 = vmatpush.bf16.msra.mxu0 %v975_v40 }
  0x6c   : > { %425 = vrot.lane.b32.xlu2 %v1236_v54, %s1113_s28  ;;  %1009 = vmatpush.bf16.msra.mxu2 %v975_v40  ;;  %s687_s28 = ssub.s32 16, %s686_s27 }
  0x6d   : > { %400 = vrot.lane.b32.xlu1 %v1187_v4, %s1110_s25  ;;  %v468_v4 = vrot.slane %v466_v34, 1  ;;  %1008 = vmatpush.bf16.msra.mxu1 %v975_v40  ;;  %p688_p6 = scmp.lt.s32.totalorder %s687_s28, 5 }
  0x6e   : > { %v452_v43 = vpop.permute.xlu2 %451 }
  0x6f   : > { %v469_v39 = vsel %vm290_vm1, %v464_v37, %v468_v4  ;;  %s1426_s28 = smov (!%p688_p6, %s687_s28), 5 }
  0x72   : > { %485 = vrot.lane.b32.xlu0 %v1209_v28, %s1117_s5  ;;  %v974_v28 = vld [vmem:[%s1410_s1 + $0x10] sm:$0xff] }
  0x73   : > { %1013 = vmatpush.bf16.msra.mxu3 %v974_v28  ;;  %637 = vmatpush.bf16.msra.mxu0 %v974_v28 }
  0x74   : > { %478 = vrot.lane.b32.xlu2 %v469_v39, %s1116_s4  ;;  %1012 = vmatpush.bf16.msra.mxu2 %v974_v28 }
  0x75   : > { %453 = vrot.lane.b32.xlu1 %v971_v26, %s1111_s26  ;;  %1011 = vmatpush.bf16.msra.mxu1 %v974_v28  ;;  %s1378_s26 = scalar_lea.vmem %s1411_s2, %s1021_s23 }
  0x76   : > { %v437_v48 = vpop.permute.xlu2 %436 }
  0x77   : > { %1016 = vmatpush.bf16.msra.mxu3 %v973_v44  ;;  %638 = vmatpush.bf16.msra.mxu0 %v973_v44 }
  0x78   : > { %1015 = vmatpush.bf16.msra.mxu2 %v973_v44 }
  0x79   : > { %1014 = vmatpush.bf16.msra.mxu1 %v973_v44 }
  0x7a   : > { %438 = vrot.lane.b32.xlu0 %v429_v15, %s1114_s29  ;;  %s962_s29 = sshll.u32 %s1426_s28, 4 }
  0x7b   : > { %1019 = vmatpush.bf16.msra.mxu3 %v972_v46  ;;  %639 = vmatpush.bf16.msra.mxu0 %v972_v46 }
  0x7c   : > { %1018 = vmatpush.bf16.msra.mxu2 %v972_v46 }
  0x7d   : > { %1017 = vmatpush.bf16.msra.mxu1 %v972_v46 }
  0x7e   : > { %v378_v51 = vpop.permute.xlu2 %377 }
  0x82   : > { %491 = vrot.lane.b32.xlu0 %v482_v45, %s1117_s5  ;;  %s225_s5 = scalar_lea.vmem %s1412_s3, %s912_s12 }
  0x85   : > { %v399_v47 = vpop.permute.xlu1 %398 }
  0x86   : > { %v393_v57 = vpop.permute.xlu2 %392 }
  0x8c   : > { %v384_v49 = vpop.permute.xlu0 %383 }
  0x8e   : > { %v354_v3 = vpop.permute.xlu2 %353 }
  0x8f   : > { %v424_v50 = vpop.permute.xlu1 %423  ;;  %v497_v39 = vsel %vm493_vm3, %v1242_v59, %v354_v3 }
  0x94   : > { %v358_v52 = vpop.permute.xlu0 %357 }
  0x95   : > { %v501_v53 = vsel %vm493_vm3, %v1183_v1, %v358_v52 }
  0x96   : > { %v512_v54 = vsel %vm504_vm4, %v501_v53, %v384_v49  ;;  %v380_v8 = vpop.permute.xlu2 %379 }
  0x97   : > { %v477_v55 = vpop.permute.xlu1 %476  ;;  %v523_v56 = vsel %vm515_vm5, %v512_v54, %v399_v47  ;;  %v508_v40 = vsel %vm504_vm4, %v497_v39, %v380_v8 }
  0x98   : > { %v534_v58 = vsel %vm526_vm6, %v523_v56, %v424_v50 }
  0x99   : > { %v545_v61 = vsel %vm537_vm7, %v534_v58, %v437_v48 }
  0x9a   : > { %v556_v63 = vsel %vm548_vm8, %v545_v61, %v452_v43 }
  0x9b   : > { %v567_v1 = vsel %vm559_vm9, %v556_v63, %v477_v55 }
  0x9c   : > { %v352_v60 = vpop.permute.xlu0 %351 }
  0x9d   : > { %v495_v14 = vsel %vm493_vm3, %v1202_v18, %v352_v60 }
  0x9e   : > { %v395_v12 = vpop.permute.xlu2 %394  ;;  %v506_v16 = vsel %vm504_vm4, %v495_v14, %v378_v51 }
  0x9f   : > { %v356_v62 = vpop.permute.xlu1 %355  ;;  %v517_v17 = vsel %vm515_vm5, %v506_v16, %v393_v57  ;;  %v519_v28 = vsel %vm515_vm5, %v508_v40, %v395_v12  ;;  %v702_v12 = vstv %s962_s29 }
  0xa0   : > { %v499_v27 = vsel %vm493_vm3, %v1220_v36, %v356_v62 }
  0xa4   : > { %v490_v2 = vpop.permute.xlu0 %489 }
  0xa5   : > { %v578_v5 = vsel %vm570_vm10, %v567_v1, %v490_v2 }
  0xa6   : > { %960 = vmatmul.msk.bf16.vlgmr.msra.gmra.mxu3 %vm617_vm11, %v578_v5  ;;  %v420_v19 = vpop.permute.xlu2 %419 }
  0xa7   : > { %v418_v6 = vpop.permute.xlu1 %417  ;;  %v530_v43 = vsel %vm526_vm6, %v519_v28, %v420_v19 }
  0xa8   : > { %v528_v20 = vsel %vm526_vm6, %v517_v17, %v418_v6 }
  0xac   : > { %v382_v7 = vpop.permute.xlu0 %381 }
  0xad   : > { %v510_v30 = vsel %vm504_vm4, %v499_v27, %v382_v7  ;;  %v691_v7 = vlaneseq }
  0xae   : > { %v433_v29 = vpop.permute.xlu2 %432 }
  0xaf   : > { %v431_v9 = vpop.permute.xlu1 %430  ;;  %v541_v45 = vsel %vm537_vm7, %v530_v43, %v433_v29 }
  0xb0   : > { %v539_v22 = vsel %vm537_vm7, %v528_v20, %v431_v9  ;;  %v692_v9 = vshrl.u32 %v691_v7, 7 }
  0xb2   : > { %vm703_vm13 = vcmp.lt.s32.totalorder %v692_v9, %v702_v12  ;;  %v695_v16 = vadd.s32 24, %v692_v9  ;;  %v696_v20 = vadd.s32 32, %v692_v9  ;;  %v699_v40 = vadd.s32 56, %v692_v9 }
  0xb4   : > { %v397_v10 = vpop.permute.xlu0 %396  ;;  %vm706_vm15 = vcmp.lt.s32.totalorder %v695_v16, %v702_v12  ;;  %vm707_vm0 = vcmp.lt.s32.totalorder %v696_v20, %v702_v12 }
  0xb5   : > { %v521_v31 = vsel %vm515_vm5, %v510_v30, %v397_v10  ;;  %v693_v10 = vadd.s32 8, %v692_v9  ;;  %v697_v30 = vadd.s32 40, %v692_v9 }
  0xb6   : > { %v488_v4 = vpop.permute.xlu2 %487 }
  0xb7   : > { %v446_v11 = vpop.permute.xlu1 %445  ;;  %vm704_vm12 = vcmp.lt.s32.totalorder %v693_v10, %v702_v12  ;;  %vm708_vm1 = vcmp.lt.s32.totalorder %v697_v30, %v702_v12 }
  0xb8   : > { %v550_v23 = vsel %vm548_vm8, %v539_v22, %v446_v11  ;;  %v694_v11 = vadd.s32 16, %v692_v9 }
  0xba   : > { %vm705_vm14 = vcmp.lt.s32.totalorder %v694_v11, %v702_v12 }
  0xbc   : > { %v422_v13 = vpop.permute.xlu0 %421 }
  0xbd   : > { %v532_v32 = vsel %vm526_vm6, %v521_v31, %v422_v13 }
  0xbe   : > { %v386_v44 = vpop.permute.xlu2 %385 }
  0xbf   : > { %v471_v15 = vpop.permute.xlu1 %470 }
  0xc0   : > { %v561_v24 = vsel %vm559_vm9, %v550_v23, %v471_v15 }
  0xc4   : > { %v435_v21 = vpop.permute.xlu0 %434 }
  0xc5   : > { %v543_v34 = vsel %vm537_vm7, %v532_v32, %v435_v21 }
  0xc6   : > { %v426_v52 = vpop.permute.xlu2 %425 }
  0xc7   : > { %v484_v25 = vpop.permute.xlu1 %483 }
  0xc8   : > { %v572_v26 = vsel %vm570_vm10, %v561_v24, %v484_v25 }
  0xc9   : > { %957 = vmatmul.msk.bf16.vlgmr.msra.gmra.mxu0 %vm617_vm11, %v572_v26 }
  0xcc   : > { %v450_v18 = vpop.permute.xlu0 %449 }
  0xcd   : > { %v554_v35 = vsel %vm548_vm8, %v543_v34, %v450_v18 }
  0xce   : > { %v479_v58 = vpop.permute.xlu2 %478 }
  0xcf   : > { %v448_v33 = vpop.permute.xlu1 %447 }
  0xd0   : > { %v552_v46 = vsel %vm548_vm8, %v541_v45, %v448_v33 }
  0xd4   : > { %v475_v37 = vpop.permute.xlu0 %474 }
  0xd5   : > { %v565_v38 = vsel %vm559_vm9, %v554_v35, %v475_v37  ;;  %v698_v37 = vadd.s32 48, %v692_v9 }
  0xd6   : > { %v576_v36 = vsel %vm570_vm10, %v565_v38, %v488_v4 }
  0xd7   : > { %959 = vmatmul.msk.bf16.vlgmr.msra.gmra.mxu2 %vm617_vm11, %v576_v36  ;;  %v473_v41 = vpop.permute.xlu1 %472  ;;  %vm709_vm2 = vcmp.lt.s32.totalorder %v698_v37, %v702_v12 }
  0xd8   : > { %v563_v47 = vsel %vm559_vm9, %v552_v46, %v473_v41  ;;  %v700_v41 = vadd.s32 64, %v692_v9 }
  0xdc   : > { %v360_v42 = vpop.permute.xlu0 %359 }
  0xdd   : > { %v503_v59 = vsel %vm493_vm3, %v1180_v0, %v360_v42  ;;  %vm710_vm3 = vcmp.lt.s32.totalorder %v699_v40, %v702_v12 }
  0xde   : > { %v514_v51 = vsel %vm504_vm4, %v503_v59, %v386_v44  ;;  %vm711_vm4 = vcmp.lt.s32.totalorder %v700_v41, %v702_v12 }
  0xdf   : > { %v401_v50 = vpop.permute.xlu1 %400 }
  0xe0   : > { %v525_v53 = vsel %vm515_vm5, %v514_v51, %v401_v50 }
  0xe1   : > { %v536_v55 = vsel %vm526_vm6, %v525_v53, %v426_v52  ;;  %vm783_vm6 = vcmask 1040384  }
  0xe4   : > { %v486_v48 = vpop.permute.xlu0 %485 }
  0xe5   : > { %v574_v49 = vsel %vm570_vm10, %v563_v47, %v486_v48  ;;  %v701_v48 = vadd.s32 72, %v692_v9 }
  0xe6   : > { %958 = vmatmul.msk.bf16.vlgmr.msra.gmra.mxu1 %vm617_vm11, %v574_v49 }
  0xe7   : > { %v454_v57 = vpop.permute.xlu1 %453  ;;  %vm712_vm5 = vcmp.lt.s32.totalorder %v701_v48, %v702_v12 }
  0xec   : > { %v439_v54 = vpop.permute.xlu0 %438 }
  0xed   : > { %v547_v56 = vsel %vm537_vm7, %v536_v55, %v439_v54 }
  0xee   : > { %v558_v0 = vsel %vm548_vm8, %v547_v56, %v454_v57 }
  0xef   : > { %v569_v60 = vsel %vm559_vm9, %v558_v0, %v479_v58 }
  0xf4   : > { %v492_v61 = vpop.permute.xlu0 %491 }
  0xf5   : > { %v580_v62 = vsel %vm570_vm10, %v569_v60, %v492_v61 }
  0xf6   : > { %961 = vmatmul.msk.bf16.gmra.mxu3 %vm617_vm11, %v580_v62 }
 0x129   : > { %v656_v63 = vpop.f32.mrf.mxu3 }
 0x12a   : > { %v739_v44 = vsel %vm709_vm2, %v656_v63, 0.0 }
 0x12b   : > { %v764_v47 = vmul.f32 %v739_v44, %v739_v44 }
 0x131   : > { %v1380_v1 = vpop.f32.mrf.mxu3 }
 0x132   : > { %v994_v2 = vpack.c.bf16 %v1380_v1, %v656_v63  ;;  %v740_v49 = vsel %vm710_vm3, %v1380_v1, 0.0 }
 0x133   : > { %v765_v52 = vmul.f32 %v740_v49, %v740_v49 }
 0x134   : > { %1003 = vst [vmem:[%s1378_s26 + $0x18] sm:$0xff] %v994_v2  }
 0x146   : > { %v641_v3 = vpop.f32.mrf.mxu0 }
 0x147   : > { %v733_v19 = vsel %vm703_vm13, %v641_v3, 0.0 }
 0x148   : > { %v758_v23 = vmul.f32 %v733_v19, %v733_v19 }
 0x14e   : > { %v643_v5 = vpop.f32.mrf.mxu0 }
 0x14f   : > { %v979_v6 = vpack.c.bf16 %v643_v5, %v641_v3  ;;  %v734_v17 = vsel %vm704_vm12, %v643_v5, 0.0 }
 0x150   : > { %v759_v22 = vmul.f32 %v734_v17, %v734_v17  ;;  %v743_v24 = vadd.f32 %v734_v17, %v733_v19 }
 0x151   : > { %980 = vst [vmem:[%s1378_s26] sm:$0xff] %v979_v6  }
 0x152   : > { %v768_v29 = vadd.f32 %v759_v22, %v758_v23 }
 0x15a   : > { %v651_v8 = vpop.f32.mrf.mxu2 }
 0x15b   : > { %v737_v35 = vsel %vm707_vm0, %v651_v8, 0.0 }
 0x15c   : > { %v762_v38 = vmul.f32 %v737_v35, %v737_v35 }
 0x162   : > { %v653_v13 = vpop.f32.mrf.mxu2 }
 0x163   : > { %v989_v14 = vpack.c.bf16 %v653_v13, %v651_v8  ;;  %v646_v15 = vpop.f32.mrf.mxu1  ;;  %v738_v36 = vsel %vm708_vm1, %v653_v13, 0.0 }
 0x164   : > { %v735_v21 = vsel %vm705_vm14, %v646_v15, 0.0  ;;  %v763_v42 = vmul.f32 %v738_v36, %v738_v36 }
 0x165   : > { %1002 = vst [vmem:[%s1378_s26 + $0x10] sm:$0xff] %v989_v14   ;;  %v760_v25 = vmul.f32 %v735_v21, %v735_v21  ;;  %v744_v31 = vadd.f32 %v743_v24, %v735_v21 }
 0x167   : > { %v769_v33 = vadd.f32 %v768_v29, %v760_v25 }
 0x16b   : > { %v648_v26 = vpop.f32.mrf.mxu1 }
 0x16c   : > { %v984_v18 = vpack.c.bf16 %v648_v26, %v646_v15  ;;  %v736_v27 = vsel %vm706_vm15, %v648_v26, 0.0 }
 0x16d   : > { %v761_v32 = vmul.f32 %v736_v27, %v736_v27  ;;  %v745_v34 = vadd.f32 %v744_v31, %v736_v27 }
 0x16e   : > { %1001 = vst [vmem:[%s1378_s26 + $0x8] sm:$0xff] %v984_v18  }
 0x16f   : > { %v770_v4 = vadd.f32 %v769_v33, %v761_v32  ;;  %v746_v39 = vadd.f32 %v745_v34, %v737_v35 }
 0x171   : > { %v771_v28 = vadd.f32 %v770_v4, %v762_v38  ;;  %v747_v43 = vadd.f32 %v746_v39, %v738_v36 }
 0x173   : > { %v772_v45 = vadd.f32 %v771_v28, %v763_v42  ;;  %v748_v59 = vadd.f32 %v747_v43, %v739_v44 }
 0x175   : > { %v773_v51 = vadd.f32 %v772_v45, %v764_v47  ;;  %v749_v53 = vadd.f32 %v748_v59, %v740_v49 }
 0x177   : > { %v774_v56 = vadd.f32 %v773_v51, %v765_v52 }
 0x179   : > { %v661_v46 = vpop.f32.mrf.mxu3 }
 0x17a   : > { %v741_v50 = vsel %vm711_vm4, %v661_v46, 0.0 }
 0x17b   : > { %v766_v54 = vmul.f32 %v741_v50, %v741_v50  ;;  %v750_v55 = vadd.f32 %v749_v53, %v741_v50 }
 0x17d   : > { %v775_v60 = vadd.f32 %v774_v56, %v766_v54 }
 0x181   : > { %v663_v57 = vpop.f32.mrf.mxu3 }
 0x182   : > { %v999_v0 = vpack.c.bf16 %v663_v57, %v661_v46  ;;  %v742_v58 = vsel %vm712_vm5, %v663_v57, 0.0 }
 0x183   : > { %v751_v61 = vadd.f32 %v750_v55, %v742_v58  ;;  %v767_v62 = vmul.f32 %v742_v58, %v742_v58 }
 0x184   : > { %1004 = vst [vmem:[%s1378_s26 + $0x20] sm:$0xff] %v999_v0  }
 0x185   : > { %v752_v63 = vrot.slane %v751_v61, 4  ;;  %v776_v2 = vadd.f32 %v775_v60, %v767_v62 }
 0x187   : > { %v753_v3 = vadd.f32 %v752_v63, %v751_v61  ;;  %v777_v1 = vrot.slane %v776_v2, 4 }
 0x189   : > { %v754_v5 = vrot.slane %v753_v3, 2  ;;  %v778_v6 = vadd.f32 %v777_v1, %v776_v2 }
 0x18b   : > { %v755_v7 = vadd.f32 %v754_v5, %v753_v3  ;;  %v779_v8 = vrot.slane %v778_v6, 2 }
 0x18d   : > { %v756_v9 = vrot.slane %v755_v7, 1  ;;  %v780_v10 = vadd.f32 %v779_v8, %v778_v6 }
 0x18f   : > { %v781_v11 = vrot.slane %v780_v10, 1  ;;  %v757_v12 = vadd.f32 %v756_v9, %v755_v7 }
 0x191   : > { %v782_v13 = vadd.f32 %v781_v11, %v780_v10 }
 0x193   : > { %v784_v14 = vsel %vm783_vm6, %v757_v12, %v782_v13 }
 0x194   : > { %785 = vst [vmem:[%s225_s5] sm:$0x3] %v784_v14 }
 0x195 PF: > { %s14_s16 = sadd.s32 1, %s1108_s16   ;;  %s1413_s12 = smov %s1100_s14 }
 0x196   : > { %p11_p7 = scmp.ge.s32.totalorder %s14_s16, 10   ;;  %s1414_s13 = smov %s1104_s15 }
 0x197   : > { %s1415_s14 = smov %s1418_s17  ;;  %s1416_s15 = smov %s1422_s18 }
 0x198   :  { %13 = sbr.rel (!%p11_p7) target bundleno = 3 (0x3), region = 70 }

// kernel: vgg_block.5
= control target key start
LH: loop header
LB: loop body
LE: loop exit
PB: predicated region body
PF: predicated region fallthrough
CT: control target
= control target key end

     0   :  { %s454_s12 = smov 0   ;;  %s559_s0 = inlined_call_operand.vmem [shape: bf16[640,128], index: 0, kind: input, shape index: {}]   ;;  %s560_s1 = inlined_call_operand.vmem [shape: f32[1,128], index: 1, kind: input, shape index: {}]   ;;  %s561_s2 = inlined_call_operand.vmem [shape: f32[1,128], index: 2, kind: input, shape index: {}]   ;;  %s562_s3 = inlined_call_operand.vmem [shape: f32[640,128], index: 3, kind: output, shape index: {}]  }
   0x1 LB: > { %s358_s13 = sadd.s32 4294967295, %s432_s12   ;;  %p362_p0 = scmp.ge.s32.totalorder %s432_s12, 1  ;;  %s432_s12 = sphi %s454_s12, %s13_s12  }
   0x2   : > { %p138_p1 = scmp.lt.s32.totalorder %s432_s12, 5 }
   0x4   : > { %p139_p2 = pnand %p362_p0, %p138_p1 }
   0x5   : > { %s162_s14 = smul.u32 (!%p139_p2), 20, %s358_s13 }
   0x6   : > { %142 = sbr.rel (%p139_p2) target bundleno = 43 (0x2b), region = 32 }
   0x7   : > { %p163_p3 = scmp.lt.s32.totalorder (!%p139_p2), %s162_s14, 79 }
   0xb   : > { %s564_s14 = smov (!%p163_p3, %s162_s14), 79  ;;  %v473_v0 = vld [vmem:[%s560_s1] ss:$0 sm:$0xff] }
   0xc   : > { %s363_s15 = sshll.u32 %s564_s14, 2  ;;  %v481_v5 = vld [vmem:[%s561_s2] ss:$0 sm:$0xff]  ;;  %s364_s23 = sshll.u32 %s564_s14, 3 }
   0xd   : > { %s468_s18 = scalar_lea.vmem %s559_s0, %s363_s15  ;;  %s500_s26 = scalar_lea.vmem %s562_s3, %s364_s23 }
   0xe   : > { %v368_v1 = vld [vmem:[%s468_s18] sm:$0xff]   ;;  %v407_v2 = vld [vmem:[%s468_s18 + $0x8] sm:$0xff]   ;;  %v408_v3 = vld [vmem:[%s468_s18 + $0x10] sm:$0xff]  }
   0xf   : > { %v369_v4 = vunpack.c.l.bf16 %v368_v1  ;;  %v370_v6 = vunpack.c.h.bf16 %v368_v1  ;;  %v373_v7 = vunpack.c.l.bf16 %v407_v2  ;;  %v374_v8 = vunpack.c.h.bf16 %v407_v2  ;;  %v409_v9 = vld [vmem:[%s468_s18 + $0x18] sm:$0xff]   ;;  %v410_v30 = vld [vmem:[%s468_s18 + $0x20] sm:$0xff]   ;;  %v411_v31 = vld [vmem:[%s468_s18 + $0x28] sm:$0xff]  }
  0x10   : > { %v377_v10 = vunpack.c.l.bf16 %v408_v3  ;;  %v378_v11 = vunpack.c.h.bf16 %v408_v3  ;;  %v381_v12 = vunpack.c.l.bf16 %v409_v9  ;;  %v382_v13 = vunpack.c.h.bf16 %v409_v9  ;;  %v412_v36 = vld [vmem:[%s468_s18 + $0x30] sm:$0xff]   ;;  %v413_v37 = vld [vmem:[%s468_s18 + $0x38] sm:$0xff]   ;;  %v414_v2 = vld [vmem:[%s468_s18 + $0x40] sm:$0xff]  }
  0x11   : > { %v218_v14 = vmul.f32 %v473_v0, %v369_v4  ;;  %v219_v15 = vmul.f32 %v473_v0, %v370_v6  ;;  %v220_v16 = vmul.f32 %v473_v0, %v373_v7  ;;  %v221_v17 = vmul.f32 %v473_v0, %v374_v8  ;;  %v415_v3 = vld [vmem:[%s468_s18 + $0x48] sm:$0xff]  }
  0x12   : > { %v222_v18 = vmul.f32 %v473_v0, %v377_v10  ;;  %v223_v19 = vmul.f32 %v473_v0, %v378_v11  ;;  %v224_v20 = vmul.f32 %v473_v0, %v381_v12  ;;  %v225_v21 = vmul.f32 %v473_v0, %v382_v13 }
  0x13   : > { %v242_v22 = vadd.f32 %v481_v5, %v218_v14  ;;  %v243_v23 = vadd.f32 %v481_v5, %v219_v15  ;;  %v244_v24 = vadd.f32 %v481_v5, %v220_v16  ;;  %v245_v25 = vadd.f32 %v481_v5, %v221_v17 }
  0x14   : > { %v246_v26 = vadd.f32 %v481_v5, %v222_v18  ;;  %v247_v27 = vadd.f32 %v481_v5, %v223_v19  ;;  %v248_v28 = vadd.f32 %v481_v5, %v224_v20  ;;  %v249_v29 = vadd.f32 %v481_v5, %v225_v21 }
  0x15   : > { %v262_v32 = vmax.f32 %v242_v22, 0.0  ;;  %v263_v33 = vmax.f32 %v243_v23, 0.0  ;;  %v264_v34 = vmax.f32 %v244_v24, 0.0  ;;  %v265_v35 = vmax.f32 %v245_v25, 0.0 }
  0x16   : > { %v266_v38 = vmax.f32 %v246_v26, 0.0  ;;  %v267_v39 = vmax.f32 %v247_v27, 0.0  ;;  %v268_v40 = vmax.f32 %v248_v28, 0.0  ;;  %v269_v41 = vmax.f32 %v249_v29, 0.0 }
  0x17   : > { %282 = vst [vmem:[%s500_s26] sm:$0xff] %v262_v32  ;;  %v385_v42 = vunpack.c.l.bf16 %v410_v30  ;;  %v386_v43 = vunpack.c.h.bf16 %v410_v30  ;;  %v389_v44 = vunpack.c.l.bf16 %v411_v31  ;;  %v390_v45 = vunpack.c.h.bf16 %v411_v31 }
  0x18   : > { %283 = vst [vmem:[%s500_s26 + $0x8] sm:$0xff] %v263_v33  ;;  %v393_v46 = vunpack.c.l.bf16 %v412_v36  ;;  %v394_v47 = vunpack.c.h.bf16 %v412_v36  ;;  %v397_v48 = vunpack.c.l.bf16 %v413_v37  ;;  %v398_v49 = vunpack.c.h.bf16 %v413_v37 }
  0x19   : > { %284 = vst [vmem:[%s500_s26 + $0x10] sm:$0xff] %v264_v34  ;;  %v226_v50 = vmul.f32 %v473_v0, %v385_v42  ;;  %v227_v51 = vmul.f32 %v473_v0, %v386_v43  ;;  %v228_v52 = vmul.f32 %v473_v0, %v389_v44  ;;  %v229_v53 = vmul.f32 %v473_v0, %v390_v45 }
  0x1a   : > { %285 = vst [vmem:[%s500_s26 + $0x18] sm:$0xff] %v265_v35  ;;  %v230_v54 = vmul.f32 %v473_v0, %v393_v46  ;;  %v231_v55 = vmul.f32 %v473_v0, %v394_v47  ;;  %v232_v56 = vmul.f32 %v473_v0, %v397_v48  ;;  %v233_v57 = vmul.f32 %v473_v0, %v398_v49 }
  0x1b   : > { %286 = vst [vmem:[%s500_s26 + $0x20] sm:$0xff] %v266_v38  ;;  %v250_v58 = vadd.f32 %v481_v5, %v226_v50  ;;  %v251_v59 = vadd.f32 %v481_v5, %v227_v51  ;;  %v252_v60 = vadd.f32 %v481_v5, %v228_v52  ;;  %v253_v61 = vadd.f32 %v481_v5, %v229_v53 }
  0x1c   : > { %287 = vst [vmem:[%s500_s26 + $0x28] sm:$0xff] %v267_v39  ;;  %v254_v62 = vadd.f32 %v481_v5, %v230_v54  ;;  %v255_v63 = vadd.f32 %v481_v5, %v231_v55  ;;  %v256_v1 = vadd.f32 %v481_v5, %v232_v56  ;;  %v257_v10 = vadd.f32 %v481_v5, %v233_v57 }
  0x1d   : > { %288 = vst [vmem:[%s500_s26 + $0x30] sm:$0xff] %v268_v40  ;;  %v270_v4 = vmax.f32 %v250_v58, 0.0  ;;  %v271_v6 = vmax.f32 %v251_v59, 0.0  ;;  %v272_v7 = vmax.f32 %v252_v60, 0.0  ;;  %v273_v8 = vmax.f32 %v253_v61, 0.0 }
  0x1e   : > { %289 = vst [vmem:[%s500_s26 + $0x38] sm:$0xff] %v269_v41  ;;  %v274_v9 = vmax.f32 %v254_v62, 0.0  ;;  %v401_v11 = vunpack.c.l.bf16 %v414_v2  ;;  %v402_v12 = vunpack.c.h.bf16 %v414_v2  ;;  %v405_v13 = vunpack.c.l.bf16 %v415_v3 }
  0x1f   : > { %290 = vst [vmem:[%s500_s26 + $0x40] sm:$0xff] %v270_v4  ;;  %v406_v14 = vunpack.c.h.bf16 %v415_v3  ;;  %v275_v15 = vmax.f32 %v255_v63, 0.0  ;;  %v276_v16 = vmax.f32 %v256_v1, 0.0  ;;  %v277_v21 = vmax.f32 %v257_v10, 0.0 }
  0x20   : > { %291 = vst [vmem:[%s500_s26 + $0x48] sm:$0xff] %v271_v6  ;;  %v234_v17 = vmul.f32 %v473_v0, %v401_v11  ;;  %v235_v18 = vmul.f32 %v473_v0, %v402_v12  ;;  %v236_v19 = vmul.f32 %v473_v0, %v405_v13 }
  0x21   : > { %292 = vst [vmem:[%s500_s26 + $0x50] sm:$0xff] %v272_v7  ;;  %v237_v20 = vmul.f32 %v473_v0, %v406_v14 }
  0x22   : > { %293 = vst [vmem:[%s500_s26 + $0x58] sm:$0xff] %v273_v8  ;;  %v258_v22 = vadd.f32 %v481_v5, %v234_v17  ;;  %v259_v23 = vadd.f32 %v481_v5, %v235_v18  ;;  %v260_v24 = vadd.f32 %v481_v5, %v236_v19 }
  0x23   : > { %294 = vst [vmem:[%s500_s26 + $0x60] sm:$0xff] %v274_v9  ;;  %v261_v25 = vadd.f32 %v481_v5, %v237_v20 }
  0x24   : > { %295 = vst [vmem:[%s500_s26 + $0x68] sm:$0xff] %v275_v15  ;;  %v278_v26 = vmax.f32 %v258_v22, 0.0  ;;  %v279_v27 = vmax.f32 %v259_v23, 0.0  ;;  %v280_v28 = vmax.f32 %v260_v24, 0.0 }
  0x25   : > { %296 = vst [vmem:[%s500_s26 + $0x70] sm:$0xff] %v276_v16  ;;  %v281_v0 = vmax.f32 %v261_v25, 0.0 }
  0x26   : > { %297 = vst [vmem:[%s500_s26 + $0x78] sm:$0xff] %v277_v21 }
  0x27   : > { %298 = vst [vmem:[%s500_s26 + $0x80] sm:$0xff] %v278_v26 }
  0x28   : > { %299 = vst [vmem:[%s500_s26 + $0x88] sm:$0xff] %v279_v27 }
  0x29   : > { %300 = vst [vmem:[%s500_s26 + $0x90] sm:$0xff] %v280_v28 }
  0x2a   : > { %301 = vst [vmem:[%s500_s26 + $0x98] sm:$0xff] %v281_v0 }
  0x2b PF: > { %s13_s12 = sadd.s32 1, %s432_s12  }
  0x2c   : > { %p10_p4 = scmp.ge.s32.totalorder %s13_s12, 6  }
  0x2e   :  { %12 = sbr.rel (!%p10_p4) target bundleno = 1 (0x1), region = 62 }

// kernel: vgg_block.4
= control target key start
LH: loop header
LB: loop body
LE: loop exit
PB: predicated region body
PF: predicated region fallthrough
CT: control target
= control target key end

     0   :  { %s2107_s12 = smov 0   ;;  %s2109_s13 = smov 0   ;;  %s2559_s0 = inlined_call_operand.vmem [shape: bf16[8,7,18,128], index: 0, kind: input, shape index: {}]   ;;  %s2560_s1 = inlined_call_operand.vmem [shape: bf16[1152,128], index: 1, kind: input, shape index: {}]   ;;  %s2561_s2 = inlined_call_operand.vmem [shape: bf16[8,80,128], index: 2, kind: output, shape index: {0}]   ;;  %s2562_s3 = inlined_call_operand.vmem [shape: f32[8,2,128], index: 3, kind: output, shape index: {1}]  }
   0x1   :  { %s2111_s14 = smov 0   ;;  %s2113_s15 = smov 0  }
   0x2   :  { %s2115_s16 = smov 0  }
   0x3 LB: > { %s23_s17 = sadd.s32 1, %s2077_s14  ;;  %s26_s18 = sadd.s32 1, %s2081_s15  ;;  %s2085_s16 = sphi %s2115_s16, %s14_s16   ;;  %s2081_s15 = sphi %s2113_s15, %s2566_s15   ;;  %s2077_s14 = sphi %s2111_s14, %s2565_s14   ;;  %s2073_s13 = sphi %s2109_s13, %s2564_s13   ;;  %s2069_s12 = sphi %s2107_s12, %s2563_s12  }
   0x4   : > { %p24_p0 = scmp.ge.s32.totalorder %s23_s17, 4  ;;  %p1555_p1 = scmp.ge.s32.totalorder %s2085_s16, 1 }
   0x5   : > { %p168_p2 = scmp.lt.s32.totalorder %s2085_s16, 9 }
   0x6   : > { %s2568_s17 = smov (%p24_p0, %s23_s17), 0  ;;  %s2570_s18 = smov (!%p24_p0, %s26_s18), %s2081_s15 }
   0x7   : > { %p169_p3 = pnand %p1555_p1, %p168_p2  ;;  %p28_p4 = scmp.ge.s32.totalorder %s2570_s18, 2 }
   0x8   : > { %s1556_s29 = sshll.u32 (!%p169_p3), %s2073_s13, 2 }
   0x9   : > { %s2572_s18 = smov (%p28_p4, %s2570_s18), 0  ;;  %172 = sbr.rel (%p169_p3) target bundleno = 390 (0x186), region = 28 }
   0xa   : > { %s203_s7 = sadd.s32 (!%p169_p3), %s2069_s12, %s1556_s29 }
   0xb   : > { %p204_p5 = scmp.lt.s32.totalorder (!%p169_p3), %s203_s7, 7 }
   0xe   : > { %v1895_v0 = vld [vmem:[%s2560_s1 + $0x38] sm:$0xff]  ;;  %v1894_v1 = vld [vmem:[%s2560_s1 + $0x30] sm:$0xff]  ;;  %v1893_v4 = vld [vmem:[%s2560_s1 + $0x28] sm:$0xff]  ;;  %s2574_s7 = smov (!%p204_p5, %s203_s7), 7  ;;  %vm360_vm0 = vcmask 1046528   ;;  %vm1432_vm12 = vcmask 1040384  }
   0xf   : > { %1009 = vmatpush.bf16.msra.mxu0 %v1895_v0  ;;  %1989 = vmatpush.bf16.msra.mxu1 %v1895_v0  ;;  %v1919_v2 = vld [vmem:[%s2560_s1 + $0xf8] sm:$0xff]  ;;  %v1918_v3 = vld [vmem:[%s2560_s1 + $0xf0] sm:$0xff]  ;;  %v1917_v5 = vld [vmem:[%s2560_s1 + $0xe8] sm:$0xff]  ;;  %s2005_s26 = smul.u32 84, %s2574_s7  ;;  %vm294_vm1 = vsmask.f32 7424 }
  0x10   : > { %1990 = vmatpush.bf16.msra.mxu2 %v1895_v0  ;;  %1111 = vmatpush.bf16.msra.mxu3 %v1919_v2  ;;  %v1892_v6 = vld [vmem:[%s2560_s1 + $0x20] sm:$0xff]  ;;  %v1891_v8 = vld [vmem:[%s2560_s1 + $0x18] sm:$0xff]  ;;  %v1890_v10 = vld [vmem:[%s2560_s1 + $0x10] sm:$0xff]  ;;  %s2006_s9 = smul.u32 40, %s2574_s7  ;;  %s1561_s19 = sshll.u32 %s2574_s7, 1 }
  0x11   : > { %v1916_v7 = vld [vmem:[%s2560_s1 + $0xe0] sm:$0xff]  ;;  %v1915_v9 = vld [vmem:[%s2560_s1 + $0xd8] sm:$0xff]  ;;  %v1914_v11 = vld [vmem:[%s2560_s1 + $0xd0] sm:$0xff]  ;;  %s2194_s6 = scalar_lea.vmem %s2559_s0, %s2005_s26  ;;  %s225_s22 = scalar_lea.vmem %s2562_s3, %s1561_s19 }
  0x12   : > { %v1889_v12 = vld [vmem:[%s2560_s1 + $0x8] sm:$0xff]  ;;  %v1888_v14 = vld [vmem:[%s2560_s1] sm:$0xff]  ;;  %v1903_v15 = vld [vmem:[%s2560_s1 + $0x78] sm:$0xff]  ;;  %s2510_s13 = scalar_lea.vmem %s2561_s2, %s2006_s9 }
  0x13   : > { %1010 = vmatpush.bf16.msra.mxu0 %v1894_v1  ;;  %1991 = vmatpush.bf16.msra.mxu1 %v1894_v1  ;;  %v1913_v13 = vld [vmem:[%s2560_s1 + $0xc8] sm:$0xff]  ;;  %v1911_v16 = vld [vmem:[%s2560_s1 + $0xb8] sm:$0xff]  ;;  %v2206_v18 = vld [vmem:[%s2194_s6] sm:$0xff] }
  0x14   : > { %1992 = vmatpush.bf16.msra.mxu2 %v1894_v1  ;;  %1112 = vmatpush.bf16.msra.mxu3 %v1918_v3  ;;  %v1927_v17 = vld [vmem:[%s2560_s1 + $0x138] sm:$0xff]  ;;  %v2212_v20 = vld [vmem:[%s2194_s6 + $0x30] sm:$0xff]  ;;  %v1912_v21 = vld [vmem:[%s2560_s1 + $0xc0] sm:$0xff]  ;;  %v298_v45 = vshll.u32 %v2206_v18, 16  ;;  %v296_v53 = vshrl.u32 %v2206_v18, 16  ;;  %v361_v61 = vrot.slane %v2206_v18, 1 }
  0x15   : > { %v2209_v19 = vld [vmem:[%s2194_s6 + $0x18] sm:$0xff]  ;;  %v1902_v22 = vld [vmem:[%s2560_s1 + $0x70] sm:$0xff]  ;;  %v1901_v26 = vld [vmem:[%s2560_s1 + $0x68] sm:$0xff] }
  0x16   : > { %v1951_v23 = vld [vmem:[%s2560_s1 + $0x1f8] sm:$0xff]  ;;  %v1910_v24 = vld [vmem:[%s2560_s1 + $0xb0] sm:$0xff]  ;;  %v1909_v29 = vld [vmem:[%s2560_s1 + $0xa8] sm:$0xff]  ;;  %v300_v54 = vrot.slane %v298_v45, 1 }
  0x17   : > { %1011 = vmatpush.bf16.msra.mxu0 %v1893_v4  ;;  %1993 = vmatpush.bf16.msra.mxu1 %v1893_v4  ;;  %v1926_v25 = vld [vmem:[%s2560_s1 + $0x130] sm:$0xff]  ;;  %v1925_v30 = vld [vmem:[%s2560_s1 + $0x128] sm:$0xff]  ;;  %v1900_v31 = vld [vmem:[%s2560_s1 + $0x60] sm:$0xff] }
  0x18   : > { %1994 = vmatpush.bf16.msra.mxu2 %v1893_v4  ;;  %1113 = vmatpush.bf16.msra.mxu3 %v1917_v5  ;;  %v2236_v27 = vld [vmem:[%s2194_s6 + $0xc] sm:$0xff]  ;;  %v1908_v32 = vld [vmem:[%s2560_s1 + $0xa0] sm:$0xff]  ;;  %v1899_v34 = vld [vmem:[%s2560_s1 + $0x58] sm:$0xff]  ;;  %v301_v2 = vor.u32 %v300_v54, %v296_v53  ;;  %v367_v53 = vrot.slane %v2209_v19, 1 }
  0x19   : > { %v1950_v28 = vld [vmem:[%s2560_s1 + $0x1f0] sm:$0xff]  ;;  %v1924_v33 = vld [vmem:[%s2560_s1 + $0x120] sm:$0xff]  ;;  %v230_v35 = vld [vmem:[%s2194_s6 + $0x8] sm:$0x1]  ;;  %v310_v49 = vshll.u32 %v2236_v27, 16  ;;  %v308_v56 = vshrl.u32 %v2236_v27, 16 }
  0x1a   : > { %v233_v36 = vld [vmem:[%s2194_s6 + $0x14] sm:$0x1]  ;;  %v1907_v37 = vld [vmem:[%s2560_s1 + $0x98] sm:$0xff]  ;;  %v2269_v39 = vld [vmem:[%s2194_s6 + $0x24] sm:$0xff]  ;;  %v284_v40 = vunpack.c.l.b16 %v230_v35 }
  0x1b   : > { %1012 = vmatpush.bf16.msra.mxu0 %v1892_v6  ;;  %1995 = vmatpush.bf16.msra.mxu1 %v1892_v6  ;;  %v1923_v38 = vld [vmem:[%s2560_s1 + $0x118] sm:$0xff]  ;;  %v285_v41 = vunpack.c.l.b16 %v233_v36  ;;  %v1898_v42 = vld [vmem:[%s2560_s1 + $0x50] sm:$0xff]  ;;  %v1949_v46 = vld [vmem:[%s2560_s1 + $0x1e8] sm:$0xff]  ;;  %v312_v57 = vrot.slane %v310_v49, 1 }
  0x1c   : > { %1996 = vmatpush.bf16.msra.mxu2 %v1892_v6  ;;  %1114 = vmatpush.bf16.msra.mxu3 %v1916_v7  ;;  %v1906_v43 = vld [vmem:[%s2560_s1 + $0x90] sm:$0xff]  ;;  %v289_v47 = vpack.c.b16 %v284_v40, %v284_v40  ;;  %v1897_v50 = vld [vmem:[%s2560_s1 + $0x48] sm:$0xff]  ;;  %v1896_v59 = vld [vmem:[%s2560_s1 + $0x40] sm:$0xff] }
  0x1d   : > { %v1922_v44 = vld [vmem:[%s2560_s1 + $0x110] sm:$0xff]  ;;  %v2286_v48 = vpack.c.b16 %v285_v41, %v285_v41  ;;  %v1905_v51 = vld [vmem:[%s2560_s1 + $0x88] sm:$0xff]  ;;  %v1904_v60 = vld [vmem:[%s2560_s1 + $0x80] sm:$0xff]  ;;  %v313_v4 = vor.u32 %v312_v57, %v308_v56 }
  0x1e   : > { %v1921_v52 = vld [vmem:[%s2560_s1 + $0x108] sm:$0xff]  ;;  %v303_v55 = vshll.u32 %v289_v47, 16  ;;  %v362_v62 = vrot.slane %v289_v47, 1  ;;  %v1920_v63 = vld [vmem:[%s2560_s1 + $0x100] sm:$0xff]  ;;  %v1943_v0 = vld [vmem:[%s2560_s1 + $0x1b8] sm:$0xff] }
  0x1f   : > { %1013 = vmatpush.bf16.msra.mxu0 %v1891_v8  ;;  %1997 = vmatpush.bf16.msra.mxu1 %v1891_v8  ;;  %v315_v58 = vshll.u32 %v2286_v48, 16  ;;  %v1935_v1 = vld [vmem:[%s2560_s1 + $0x178] sm:$0xff]  ;;  %v236_v7 = vld [vmem:[%s2194_s6 + $0x20] sm:$0x1]  ;;  %v1938_v41 = vld [vmem:[%s2560_s1 + $0x190] sm:$0xff] }
  0x20   : > { %1998 = vmatpush.bf16.msra.mxu2 %v1891_v8  ;;  %1115 = vmatpush.bf16.msra.mxu3 %v1915_v9  ;;  %v305_v3 = vrot.slane %v303_v55, 1  ;;  %v1959_v6 = vld [vmem:[%s2560_s1 + $0x238] sm:$0xff]  ;;  %v363_v8 = vsel %vm360_vm0, %v361_v61, %v362_v62  ;;  %v1937_v47 = vld [vmem:[%s2560_s1 + $0x188] sm:$0xff] }
  0x21   : > { %v317_v5 = vrot.slane %v315_v58, 1  ;;  %v1939_v35 = vld [vmem:[%s2560_s1 + $0x198] sm:$0xff]  ;;  %v1945_v49 = vld [vmem:[%s2560_s1 + $0x1c8] sm:$0xff] }
  0x22   : > { %v306_v9 = vsel %vm294_vm1, %v301_v2, %v305_v3  ;;  %v1931_v36 = vld [vmem:[%s2560_s1 + $0x158] sm:$0xff]  ;;  %v1929_v61 = vld [vmem:[%s2560_s1 + $0x148] sm:$0xff]  ;;  %v346_v3 = vshll.u32 %v2212_v20, 16 }
  0x23   : > { %1014 = vmatpush.bf16.msra.mxu0 %v1890_v10  ;;  %1999 = vmatpush.bf16.msra.mxu1 %v1890_v10  ;;  %v242_v57 = vld [vmem:[%s2194_s6 + $0x38] sm:$0x1]  ;;  %v2414_v62 = vld [vmem:[%s2194_s6 + $0x3c] sm:$0xff] }
  0x24   : > { %2000 = vmatpush.bf16.msra.mxu2 %v1890_v10  ;;  %1116 = vmatpush.bf16.msra.mxu3 %v1914_v11  ;;  %v318_v10 = vsel %vm294_vm1, %v313_v4, %v317_v5  ;;  %v1942_v11 = vld [vmem:[%s2560_s1 + $0x1b0] sm:$0xff]  ;;  %v1928_v4 = vld [vmem:[%s2560_s1 + $0x140] sm:$0xff]  ;;  %v344_v5 = vshrl.u32 %v2212_v20, 16 }
  0x27   : > { %1015 = vmatpush.bf16.msra.mxu0 %v1889_v12  ;;  %2001 = vmatpush.bf16.msra.mxu1 %v1889_v12 }
  0x28   : > { %2002 = vmatpush.bf16.msra.mxu2 %v1889_v12  ;;  %1117 = vmatpush.bf16.msra.mxu3 %v1913_v13  ;;  %v1934_v12 = vld [vmem:[%s2560_s1 + $0x170] sm:$0xff]  ;;  %v286_v13 = vunpack.c.l.b16 %v236_v7 }
  0x2b   : > { %1016 = vmatpush.bf16.msra.mxu0 %v1888_v14  ;;  %2003 = vmatpush.bf16.msra.mxu1 %v1888_v14 }
  0x2c   : > { %2004 = vmatpush.bf16.msra.mxu2 %v1888_v14  ;;  %1118 = vmatpush.bf16.msra.mxu3 %v1912_v21  ;;  %v1958_v14 = vld [vmem:[%s2560_s1 + $0x230] sm:$0xff]  ;;  %v1933_v21 = vld [vmem:[%s2560_s1 + $0x168] sm:$0xff] }
  0x2e   : > { %1017 = vmatmul.bf16.vlgmr.msra.gmra.mxu0 %v2206_v18  ;;  %1027 = vmatmul.bf16.vlgmr.msra.gmra.mxu1 %v2209_v19  ;;  %v1941_v18 = vld [vmem:[%s2560_s1 + $0x1a8] sm:$0xff] }
  0x2f   : > { %1043 = vmatpush.bf16.msrb.mxu1 %v1903_v15  ;;  %1145 = vmatpush.bf16.msrb.mxu0 %v1927_v17  ;;  %v1948_v15 = vld [vmem:[%s2560_s1 + $0x1e0] sm:$0xff]  ;;  %v322_v17 = vshll.u32 %v2209_v19, 16 }
  0x30   : > { %1077 = vmatpush.bf16.msrb.mxu2 %v1911_v16  ;;  %1247 = vmatpush.bf16.msrb.mxu3 %v1951_v23  ;;  %v2337_v16 = vpack.c.b16 %v286_v13, %v286_v13  ;;  %v1947_v23 = vld [vmem:[%s2560_s1 + $0x1d8] sm:$0xff] }
  0x31   : > { %1037 = vmatmul.bf16.vlgmr.msra.gmra.mxu2 %v2212_v20  ;;  %1119 = vmatmul.bf16.vlgmr.msra.gmra.mxu3 %v2236_v27 }
  0x32   : > { %v368_v54 = vrot.slane %v2337_v16, 1 }
  0x33   : > { %1044 = vmatpush.bf16.msrb.mxu1 %v1902_v22  ;;  %1146 = vmatpush.bf16.msrb.mxu0 %v1926_v25  ;;  %v1957_v22 = vld [vmem:[%s2560_s1 + $0x228] sm:$0xff]  ;;  %v324_v25 = vrot.slane %v322_v17, 1 }
  0x34   : > { %1078 = vmatpush.bf16.msrb.mxu2 %v1910_v24  ;;  %1248 = vmatpush.bf16.msrb.mxu3 %v1950_v28  ;;  %v320_v24 = vshrl.u32 %v2209_v19, 16  ;;  %v1940_v28 = vld [vmem:[%s2560_s1 + $0x1a0] sm:$0xff]  ;;  %v369_v58 = vsel %vm360_vm0, %v367_v53, %v368_v54  ;;  %v403_v53 = vrot.slane %v2414_v62, 1 }
  0x37   : > { %1045 = vmatpush.bf16.msrb.mxu1 %v1901_v26  ;;  %1147 = vmatpush.bf16.msrb.mxu0 %v1925_v30  ;;  %v327_v26 = vshll.u32 %v2337_v16, 16  ;;  %v1956_v30 = vld [vmem:[%s2560_s1 + $0x220] sm:$0xff] }
  0x38   : > { %1079 = vmatpush.bf16.msrb.mxu2 %v1909_v29  ;;  %1249 = vmatpush.bf16.msrb.mxu3 %v1949_v46  ;;  %v1932_v29 = vld [vmem:[%s2560_s1 + $0x160] sm:$0xff]  ;;  %v334_v46 = vshll.u32 %v2269_v39, 16 }
  0x3b   : > { %1046 = vmatpush.bf16.msrb.mxu1 %v1900_v31  ;;  %1148 = vmatpush.bf16.msrb.mxu0 %v1924_v33  ;;  %v364_v31 = vrot.slane %v2236_v27, 1  ;;  %v325_v33 = vor.u32 %v324_v25, %v320_v24  ;;  %v373_v24 = vrot.slane %v2212_v20, 1 }
  0x3c   : > { %1080 = vmatpush.bf16.msrb.mxu2 %v1908_v32  ;;  %1250 = vmatpush.bf16.msrb.mxu3 %v1948_v15  ;;  %v365_v32 = vrot.slane %v2286_v48, 1  ;;  %v1954_v48 = vld [vmem:[%s2560_s1 + $0x210] sm:$0xff] }
  0x3e   : > { %1022 = vmatmul.bf16.gmra.mxu0 %v2236_v27  ;;  %1032 = vmatmul.bf16.gmra.mxu1 %v2269_v39 }
  0x3f   : > { %1047 = vmatpush.bf16.msrb.mxu1 %v1899_v34  ;;  %1149 = vmatpush.bf16.msrb.mxu0 %v1923_v38  ;;  %v329_v34 = vrot.slane %v327_v26, 1  ;;  %v2374_v38 = vsel %vm360_vm0, %v364_v31, %v365_v32 }
  0x40   : > { %1081 = vmatpush.bf16.msrb.mxu2 %v1907_v37  ;;  %1251 = vmatpush.bf16.msrb.mxu3 %v1947_v23  ;;  %v239_v37 = vld [vmem:[%s2194_s6 + $0x2c] sm:$0x1] }
  0x41   : > { %1124 = vmatmul.bf16.gmra.mxu3 %v2209_v19  ;;  %v2377_v27 = vsel %vm294_vm1, %v325_v33, %v329_v34  ;;  %v287_v40 = vunpack.c.l.b16 %v239_v37  ;;  %v248_v33 = vld [vmem:[%s2194_s6 + $0x50] sm:$0x1]  ;;  %v1887_v34 = vld [vmem:[%s2194_s6 + $0x48] sm:$0xff] }
  0x43   : > { %1048 = vmatpush.bf16.msrb.mxu1 %v1898_v42  ;;  %1150 = vmatpush.bf16.msrb.mxu0 %v1922_v44  ;;  %v1955_v42 = vld [vmem:[%s2560_s1 + $0x218] sm:$0xff]  ;;  %v1930_v44 = vld [vmem:[%s2560_s1 + $0x150] sm:$0xff]  ;;  %v292_v45 = vpack.c.b16 %v287_v40, %v287_v40 }
  0x44   : > { %1082 = vmatpush.bf16.msrb.mxu2 %v1906_v43  ;;  %v1946_v43 = vld [vmem:[%s2560_s1 + $0x1d0] sm:$0xff] }
  0x45   : > { %1252 = vmatpush.bf16.msrb.mxu3 %v1946_v43 }
  0x47   : > { %1049 = vmatpush.bf16.msrb.mxu1 %v1897_v50  ;;  %1151 = vmatpush.bf16.msrb.mxu0 %v1921_v52  ;;  %v332_v50 = vshrl.u32 %v2269_v39, 16  ;;  %v339_v52 = vshll.u32 %v292_v45, 16 }
  0x48   : > { %1083 = vmatpush.bf16.msrb.mxu2 %v1905_v51  ;;  %v336_v51 = vrot.slane %v334_v46, 1 }
  0x49   : > { %1253 = vmatpush.bf16.msrb.mxu3 %v1945_v49  ;;  %v341_v56 = vrot.slane %v339_v52, 1 }
  0x4a   : > { %v337_v55 = vor.u32 %v336_v51, %v332_v50 }
  0x4b   : > { %1050 = vmatpush.bf16.msrb.mxu1 %v1896_v59  ;;  %1152 = vmatpush.bf16.msrb.mxu0 %v1920_v63  ;;  %v1936_v63 = vld [vmem:[%s2560_s1 + $0x180] sm:$0xff] }
  0x4c   : > { %1084 = vmatpush.bf16.msrb.mxu2 %v1904_v60  ;;  %v342_v59 = vsel %vm294_vm1, %v337_v55, %v341_v56  ;;  %v288_v60 = vunpack.c.l.b16 %v242_v57 }
  0x4e   : > { %1051 = vmatmul.bf16.vlgmr.msrb.gmra.mxu1 %v306_v9  ;;  %1153 = vmatmul.bf16.vlgmr.msrb.gmra.mxu0 %v318_v10  ;;  %v293_v2 = vpack.c.b16 %v288_v60, %v288_v60  ;;  %v371_v9 = vrot.slane %v292_v45, 1 }
  0x4f   : > { %1179 = vmatpush.bf16.msra.mxu1 %v1935_v1  ;;  %1281 = vmatpush.bf16.msra.mxu0 %v1959_v6  ;;  %v1944_v1 = vld [vmem:[%s2560_s1 + $0x1c0] sm:$0xff]  ;;  %v348_v6 = vrot.slane %v346_v3, 1 }
  0x50   : > { %1213 = vmatpush.bf16.msra.mxu2 %v1943_v0  ;;  %v1953_v0 = vld [vmem:[%s2560_s1 + $0x208] sm:$0xff]  ;;  %1254 = vmatpush.bf16.msrb.mxu3 %v1944_v1  ;;  %v351_v7 = vshll.u32 %v293_v2, 16  ;;  %v374_v25 = vrot.slane %v293_v2, 1 }
  0x51   : > { %1085 = vmatmul.bf16.vlgmr.msrb.gmra.mxu2 %v363_v8  ;;  %1129 = vmatmul.bf16.gmra.mxu3 %v2269_v39  ;;  %v370_v8 = vrot.slane %v2269_v39, 1 }
  0x53   : > { %1180 = vmatpush.bf16.msra.mxu1 %v1934_v12  ;;  %1282 = vmatpush.bf16.msra.mxu0 %v1958_v14  ;;  %v245_v12 = vld [vmem:[%s2194_s6 + $0x44] sm:$0x1]  ;;  %v372_v13 = vsel %vm360_vm0, %v370_v8, %v371_v9  ;;  %s1335_s6 = smul.u32 5, %s2069_s12 }
  0x54   : > { %1214 = vmatpush.bf16.msra.mxu2 %v1942_v11  ;;  %v353_v11 = vrot.slane %v351_v7, 1  ;;  %v1952_v14 = vld [vmem:[%s2560_s1 + $0x200] sm:$0xff]  ;;  %v388_v16 = vunpack.c.l.b16 %v245_v12 }
  0x55   : > { %s1336_s8 = ssub.s32 16, %s1335_s6 }
  0x56   : > { %v389_v17 = vpack.c.b16 %v388_v16, %v388_v16  ;;  %p1337_p6 = scmp.lt.s32.totalorder %s1336_s8, 5 }
  0x57   : > { %1181 = vmatpush.bf16.msra.mxu1 %v1933_v21  ;;  %1283 = vmatpush.bf16.msra.mxu0 %v1957_v22  ;;  %v391_v21 = vshrl.u32 %v2414_v62, 16 }
  0x58   : > { %1215 = vmatpush.bf16.msra.mxu2 %v1941_v18  ;;  %v393_v18 = vshll.u32 %v2414_v62, 16  ;;  %v398_v23 = vshll.u32 %v389_v17, 16  ;;  %v404_v54 = vrot.slane %v389_v17, 1  ;;  %s2576_s8 = smov (!%p1337_p6, %s1336_s8), 5 }
  0x59   : > { %s1878_s12 = sshll.u32 %s2576_s8, 4 }
  0x5a   : > { %v395_v22 = vrot.slane %v393_v18, 1 }
  0x5b   : > { %1182 = vmatpush.bf16.msra.mxu1 %v1932_v29  ;;  %1284 = vmatpush.bf16.msra.mxu0 %v1956_v30  ;;  %v375_v29 = vsel %vm360_vm0, %v373_v24, %v374_v25 }
  0x5c   : > { %1216 = vmatpush.bf16.msra.mxu2 %v1940_v28  ;;  %v396_v26 = vor.u32 %v395_v22, %v391_v21  ;;  %v400_v28 = vrot.slane %v398_v23, 1 }
  0x5e   : > { %1056 = vmatmul.bf16.gmra.mxu1 %v318_v10  ;;  %1158 = vmatmul.bf16.gmra.mxu0 %v2377_v27  ;;  %v349_v10 = vor.u32 %v348_v6, %v344_v5  ;;  %v401_v30 = vsel %vm294_vm1, %v396_v26, %v400_v28  ;;  %v429_v5 = vrot.slane %v1887_v34, 1 }
  0x5f   : > { %1183 = vmatpush.bf16.msra.mxu1 %v1931_v36  ;;  %1285 = vmatpush.bf16.msra.mxu0 %v1955_v42 }
  0x60   : > { %1217 = vmatpush.bf16.msra.mxu2 %v1939_v35  ;;  %v354_v15 = vsel %vm294_vm1, %v349_v10, %v353_v11  ;;  %v414_v35 = vunpack.c.l.b16 %v248_v33 }
  0x61   : > { %1090 = vmatmul.bf16.gmra.mxu2 %v2374_v38  ;;  %1134 = vmatmul.bf16.gmra.mxu3 %v2212_v20 }
  0x63   : > { %1184 = vmatpush.bf16.msra.mxu1 %v1930_v44  ;;  %1286 = vmatpush.bf16.msra.mxu0 %v1954_v48 }
  0x64   : > { %1218 = vmatpush.bf16.msra.mxu2 %v1938_v41 }
  0x67   : > { %1185 = vmatpush.bf16.msra.mxu1 %v1929_v61  ;;  %1287 = vmatpush.bf16.msra.mxu0 %v1953_v0 }
  0x68   : > { %1219 = vmatpush.bf16.msra.mxu2 %v1937_v47 }
  0x6b   : > { %1186 = vmatpush.bf16.msra.mxu1 %v1928_v4  ;;  %1288 = vmatpush.bf16.msra.mxu0 %v1952_v14 }
  0x6c   : > { %1220 = vmatpush.bf16.msra.mxu2 %v1936_v63 }
  0x6e   : > { %1061 = vmatmul.bf16.gmra.mxu1 %v2377_v27  ;;  %1163 = vmatmul.bf16.gmra.mxu0 %v342_v59 }
  0x71   : > { %1095 = vmatmul.bf16.gmra.mxu2 %v369_v58  ;;  %1139 = vmatmul.bf16.gmra.mxu3 %v2414_v62 }
  0x7e   : > { %1066 = vmatmul.bf16.gmra.mxu1 %v342_v59  ;;  %1168 = vmatmul.bf16.gmra.mxu0 %v354_v15 }
  0x81   : > { %1100 = vmatmul.bf16.gmra.mxu2 %v372_v13  ;;  %1255 = vmatmul.bf16.vlgmr.msrb.gmra.mxu3 %v2377_v27  ;;  %v415_v27 = vpack.c.b16 %v414_v35, %v414_v35 }
  0x83   : > { %v424_v42 = vshll.u32 %v415_v27, 16  ;;  %v430_v6 = vrot.slane %v415_v27, 1 }
  0x8e   : > { %1071 = vmatmul.bf16.gmra.mxu1 %v354_v15  ;;  %1173 = vmatmul.bf16.gmra.mxu0 %v401_v30 }
  0x91   : > { %1105 = vmatmul.bf16.gmra.mxu2 %v375_v29  ;;  %1260 = vmatmul.bf16.gmra.mxu3 %v342_v59 }
  0x9e   : > { %1187 = vmatmul.bf16.vlgmr.msra.gmra.mxu1 %v2374_v38  ;;  %1289 = vmatmul.bf16.vlgmr.msra.gmra.mxu0 %v369_v58  ;;  %v417_v38 = vshrl.u32 %v1887_v34, 16 }
  0xa1   : > { %1221 = vmatmul.bf16.vlgmr.msra.gmra.mxu2 %v2209_v19  ;;  %1265 = vmatmul.bf16.gmra.mxu3 %v354_v15  ;;  %v419_v19 = vshll.u32 %v1887_v34, 16 }
  0xa3   : > { %v421_v41 = vrot.slane %v419_v19, 1 }
  0xa5   : > { %v422_v45 = vor.u32 %v421_v41, %v417_v38 }
  0xab   : > { %v1018_v31 = vpop.f32.mrf.mxu0  ;;  %v2447_v32 = vpop.f32.mrf.mxu1 }
  0xae   : > { %1192 = vmatmul.bf16.gmra.mxu1 %v369_v58  ;;  %1294 = vmatmul.bf16.gmra.mxu0 %v372_v13 }
  0xb1   : > { %1226 = vmatmul.bf16.gmra.mxu2 %v2269_v39  ;;  %1270 = vmatmul.bf16.gmra.mxu3 %v401_v30  ;;  %v426_v39 = vrot.slane %v424_v42, 1 }
  0xb3   : > { %v1020_v36 = vpop.f32.mrf.mxu0  ;;  %v2452_v37 = vpop.f32.mrf.mxu1  ;;  %v427_v48 = vsel %vm294_vm1, %v422_v45, %v426_v39 }
  0xb4   : > { %v1120_v40 = vpop.f32.mrf.mxu3  ;;  %v2457_v46 = vpop.f32.mrf.mxu2 }
  0xbb   : > { %v1023_v43 = vpop.f32.mrf.mxu0  ;;  %v2454_v44 = vpop.f32.mrf.mxu1 }
  0xbc   : > { %v1122_v47 = vpop.f32.mrf.mxu3  ;;  %v2462_v52 = vpop.f32.mrf.mxu2 }
  0xbe   : > { %1197 = vmatmul.bf16.gmra.mxu1 %v372_v13  ;;  %1299 = vmatmul.bf16.gmra.mxu0 %v375_v29 }
  0xc1   : > { %1231 = vmatmul.bf16.gmra.mxu2 %v2212_v20  ;;  %1275 = vmatmul.bf16.gmra.mxu3 %v427_v48  ;;  %v405_v20 = vsel %vm360_vm0, %v403_v53, %v404_v54 }
  0xc3   : > { %v1025_v49 = vpop.f32.mrf.mxu0  ;;  %v2460_v50 = vpop.f32.mrf.mxu1 }
  0xc4   : > { %v1125_v51 = vpop.f32.mrf.mxu3 }
  0xcb   : > { %v1052_v55 = vpop.f32.mrf.mxu1  ;;  %v1154_v56 = vpop.f32.mrf.mxu0 }
  0xcc   : > { %v1053_v57 = vadd.f32 %v1052_v55, %v1018_v31  ;;  %v1127_v58 = vpop.f32.mrf.mxu3 }
  0xce   : > { %1202 = vmatmul.bf16.gmra.mxu1 %v375_v29  ;;  %1304 = vmatmul.bf16.gmra.mxu0 %v405_v20 }
  0xd1   : > { %1236 = vmatmul.bf16.gmra.mxu2 %v2414_v62  ;;  %v431_v62 = vsel %vm360_vm0, %v429_v5, %v430_v6 }
  0xd3   : > { %v1054_v63 = vpop.f32.mrf.mxu1  ;;  %v1156_v0 = vpop.f32.mrf.mxu0 }
  0xd4   : > { %v1086_v59 = vpop.f32.mrf.mxu2  ;;  %v1055_v1 = vadd.f32 %v1054_v63, %v1020_v36  ;;  %v1130_v3 = vpop.f32.mrf.mxu3 }
  0xd5   : > { %v1087_v60 = vadd.f32 %v1086_v59, %v1053_v57 }
  0xd7   : > { %v1121_v61 = vadd.f32 %v1120_v40, %v1087_v60 }
  0xd9   : > { %v2467_v2 = vadd.f32 %v1154_v56, %v1121_v61 }
  0xdb   : > { %v1057_v9 = vpop.f32.mrf.mxu1  ;;  %v1159_v10 = vpop.f32.mrf.mxu0 }
  0xdc   : > { %v1088_v4 = vpop.f32.mrf.mxu2  ;;  %v1058_v11 = vadd.f32 %v1057_v9, %v1023_v43  ;;  %v1132_v13 = vpop.f32.mrf.mxu3 }
  0xdd   : > { %v1089_v7 = vadd.f32 %v1088_v4, %v1055_v1 }
  0xde   : > { %1207 = vmatmul.bf16.gmra.mxu1 %v405_v20  ;;  %1309 = vmatmul.bf16.gmra.mxu0 %v431_v62 }
  0xdf   : > { %v1123_v8 = vadd.f32 %v1122_v47, %v1089_v7 }
  0xe1   : > { %1241 = vmatmul.bf16.gmra.mxu2 %v1887_v34  ;;  %v2470_v12 = vadd.f32 %v1156_v0, %v1123_v8 }
  0xe3   : > { %v1059_v17 = vpop.f32.mrf.mxu1  ;;  %v1161_v18 = vpop.f32.mrf.mxu0 }
  0xe4   : > { %v1091_v14 = vpop.f32.mrf.mxu2  ;;  %v1060_v21 = vadd.f32 %v1059_v17, %v1025_v49  ;;  %v1135_v23 = vpop.f32.mrf.mxu3 }
  0xe5   : > { %v1092_v15 = vadd.f32 %v1091_v14, %v1058_v11 }
  0xe7   : > { %v1126_v16 = vadd.f32 %v1125_v51, %v1092_v15 }
  0xe9   : > { %v2472_v22 = vadd.f32 %v1159_v10, %v1126_v16 }
  0xeb   : > { %v1062_v28 = vpop.f32.mrf.mxu1  ;;  %v1164_v29 = vpop.f32.mrf.mxu0 }
  0xec   : > { %v1093_v24 = vpop.f32.mrf.mxu2  ;;  %v1063_v30 = vadd.f32 %v1062_v28, %v2447_v32  ;;  %v1137_v35 = vpop.f32.mrf.mxu3 }
  0xed   : > { %v1094_v25 = vadd.f32 %v1093_v24, %v1060_v21 }
  0xef   : > { %v1128_v26 = vadd.f32 %v1127_v58, %v1094_v25 }
  0xf1   : > { %v2475_v31 = vadd.f32 %v1161_v18, %v1128_v26  ;;  %v2499_v26 = vstv %s1878_s12 }
  0xf3   : > { %v1064_v27 = vpop.f32.mrf.mxu1  ;;  %v1166_v19 = vpop.f32.mrf.mxu0 }
  0xf4   : > { %v1096_v33 = vpop.f32.mrf.mxu2  ;;  %v1065_v40 = vadd.f32 %v1064_v27, %v2452_v37  ;;  %v1140_v45 = vpop.f32.mrf.mxu3 }
  0xf5   : > { %v1097_v34 = vadd.f32 %v1096_v33, %v1063_v30 }
  0xf7   : > { %v1131_v36 = vadd.f32 %v1130_v3, %v1097_v34 }
  0xf9   : > { %v2478_v38 = vadd.f32 %v1164_v29, %v1131_v36 }
  0xfb   : > { %v1067_v39 = vpop.f32.mrf.mxu1  ;;  %v1169_v47 = vpop.f32.mrf.mxu0 }
  0xfc   : > { %v1098_v41 = vpop.f32.mrf.mxu2  ;;  %v1068_v32 = vadd.f32 %v1067_v39, %v2454_v44  ;;  %v1142_v37 = vpop.f32.mrf.mxu3 }
  0xfd   : > { %v1099_v42 = vadd.f32 %v1098_v41, %v1065_v40 }
  0xff   : > { %v1133_v43 = vadd.f32 %v1132_v13, %v1099_v42 }
 0x101   : > { %v2481_v48 = vadd.f32 %v1166_v19, %v1133_v43 }
 0x103   : > { %v1069_v54 = vpop.f32.mrf.mxu1  ;;  %v1171_v55 = vpop.f32.mrf.mxu0 }
 0x104   : > { %v1101_v49 = vpop.f32.mrf.mxu2  ;;  %v1070_v56 = vadd.f32 %v1069_v54, %v2460_v50  ;;  %v1256_v0 = vpop.f32.mrf.mxu3 }
 0x105   : > { %v1102_v51 = vadd.f32 %v1101_v49, %v1068_v32 }
 0x107   : > { %v1136_v53 = vadd.f32 %v1135_v23, %v1102_v51 }
 0x109   : > { %v2484_v20 = vadd.f32 %v1169_v47, %v1136_v53 }
 0x10b   : > { %v1072_v60 = vpop.f32.mrf.mxu1  ;;  %v1174_v61 = vpop.f32.mrf.mxu0 }
 0x10c   : > { %v1103_v57 = vpop.f32.mrf.mxu2  ;;  %v1073_v44 = vadd.f32 %v1072_v60, %v2457_v46  ;;  %v1258_v10 = vpop.f32.mrf.mxu3 }
 0x10d   : > { %v1104_v58 = vadd.f32 %v1103_v57, %v1070_v56 }
 0x10f   : > { %v1138_v59 = vadd.f32 %v1137_v35, %v1104_v58 }
 0x111   : > { %v2487_v63 = vadd.f32 %v1171_v55, %v1138_v59 }
 0x113   : > { %v1074_v5 = vpop.f32.mrf.mxu1  ;;  %v1176_v6 = vpop.f32.mrf.mxu0 }
 0x114   : > { %v1106_v1 = vpop.f32.mrf.mxu2  ;;  %v1075_v50 = vadd.f32 %v1074_v5, %v2462_v52  ;;  %v1340_v52 = vlaneseq  ;;  %v1261_v17 = vpop.f32.mrf.mxu3 }
 0x115   : > { %v1107_v3 = vadd.f32 %v1106_v1, %v1073_v44 }
 0x116   : > { %v2497_v25 = vshrl.u32 %v1340_v52, 7 }
 0x117   : > { %v1141_v4 = vadd.f32 %v1140_v45, %v1107_v3 }
 0x118   : > { %vm1352_vm2 = vcmp.lt.s32.totalorder %v2497_v25, %v2499_v26  ;;  %v1343_v47 = vadd.s32 16, %v2497_v25  ;;  %v1344_v59 = vadd.s32 24, %v2497_v25 }
 0x119   : > { %v2491_v7 = vadd.f32 %v1174_v61, %v1141_v4 }
 0x11a   : > { %vm1354_vm4 = vcmp.lt.s32.totalorder %v1343_v47, %v2499_v26  ;;  %vm1355_vm5 = vcmp.lt.s32.totalorder %v1344_v59, %v2499_v26 }
 0x11b   : > { %v1188_v11 = vpop.f32.mrf.mxu1  ;;  %v1290_v46 = vpop.f32.mrf.mxu0 }
 0x11c   : > { %v1108_v8 = vpop.f32.mrf.mxu2  ;;  %v1189_v13 = vadd.f32 %v1188_v11, %v2467_v2  ;;  %v1342_v2 = vadd.s32 8, %v2497_v25  ;;  %v1263_v19 = vpop.f32.mrf.mxu3 }
 0x11d   : > { %v1109_v9 = vadd.f32 %v1108_v8, %v1075_v50 }
 0x11e   : > { %vm1353_vm3 = vcmp.lt.s32.totalorder %v1342_v2, %v2499_v26 }
 0x11f   : > { %v1143_v62 = vadd.f32 %v1142_v37, %v1109_v9 }
 0x121   : > { %v2494_v14 = vadd.f32 %v1176_v6, %v1143_v62 }
 0x123   : > { %v1190_v18 = vpop.f32.mrf.mxu1  ;;  %v1292_v21 = vpop.f32.mrf.mxu0 }
 0x124   : > { %v1222_v15 = vpop.f32.mrf.mxu2  ;;  %v1191_v24 = vadd.f32 %v1190_v18, %v2470_v12  ;;  %v1266_v60 = vpop.f32.mrf.mxu3 }
 0x125   : > { %v1223_v16 = vadd.f32 %v1222_v15, %v1189_v13 }
 0x127   : > { %v1257_v23 = vadd.f32 %v1256_v0, %v1223_v16 }
 0x129   : > { %v1291_v29 = vadd.f32 %v1290_v46, %v1257_v23 }
 0x12b   : > { %v1193_v34 = vpop.f32.mrf.mxu1  ;;  %v1295_v35 = vpop.f32.mrf.mxu0  ;;  %v1382_v36 = vsel %vm1352_vm2, %v1291_v29, 0.0 }
 0x12c   : > { %v1224_v28 = vpop.f32.mrf.mxu2  ;;  %v1194_v27 = vadd.f32 %v1193_v34, %v2472_v22  ;;  %v1407_v42 = vmul.f32 %v1382_v36, %v1382_v36  ;;  %v1268_v46 = vpop.f32.mrf.mxu3 }
 0x12d   : > { %v1225_v30 = vadd.f32 %v1224_v28, %v1191_v24  ;;  %v1346_v24 = vadd.s32 40, %v2497_v25 }
 0x12f   : > { %v1259_v33 = vadd.f32 %v1258_v10, %v1225_v30  ;;  %v1345_v10 = vadd.s32 32, %v2497_v25  ;;  %vm1357_vm7 = vcmp.lt.s32.totalorder %v1346_v24, %v2499_v26 }
 0x131   : > { %v1293_v12 = vadd.f32 %v1292_v21, %v1259_v33  ;;  %vm1356_vm6 = vcmp.lt.s32.totalorder %v1345_v10, %v2499_v26 }
 0x133   : > { %v1963_v40 = vpack.c.bf16 %v1293_v12, %v1291_v29  ;;  %v1383_v41 = vsel %vm1353_vm3, %v1293_v12, 0.0  ;;  %v1195_v22 = vpop.f32.mrf.mxu1  ;;  %v1297_v53 = vpop.f32.mrf.mxu0 }
 0x134   : > { %v1392_v43 = vadd.f32 %v1383_v41, %v1382_v36  ;;  %v1408_v45 = vmul.f32 %v1383_v41, %v1383_v41  ;;  %v1227_v39 = vpop.f32.mrf.mxu2  ;;  %v1196_v55 = vadd.f32 %v1195_v22, %v2475_v31  ;;  %v1271_v30 = vpop.f32.mrf.mxu3  ;;  %v1347_v41 = vadd.s32 48, %v2497_v25 }
 0x135   : > { %1964 = vst [vmem:[%s2510_s13] sm:$0xff] %v1963_v40   ;;  %v1228_v32 = vadd.f32 %v1227_v39, %v1194_v27 }
 0x136   : > { %v1417_v49 = vadd.f32 %v1408_v45, %v1407_v42  ;;  %vm1358_vm8 = vcmp.lt.s32.totalorder %v1347_v41, %v2499_v26 }
 0x137   : > { %v1262_v51 = vadd.f32 %v1261_v17, %v1228_v32 }
 0x139   : > { %v1296_v54 = vadd.f32 %v1295_v35, %v1262_v51 }
 0x13b   : > { %v1384_v56 = vsel %vm1354_vm4, %v1296_v54, 0.0  ;;  %v1198_v1 = vpop.f32.mrf.mxu1  ;;  %v1300_v3 = vpop.f32.mrf.mxu0 }
 0x13c   : > { %v1393_v37 = vadd.f32 %v1392_v43, %v1384_v56  ;;  %v1409_v57 = vmul.f32 %v1384_v56, %v1384_v56  ;;  %v1229_v58 = vpop.f32.mrf.mxu2  ;;  %v1199_v5 = vadd.f32 %v1198_v1, %v2478_v38 }
 0x13d   : > { %v1230_v61 = vadd.f32 %v1229_v58, %v1196_v55  ;;  %v1348_v55 = vadd.s32 56, %v2497_v25 }
 0x13e   : > { %v1418_v44 = vadd.f32 %v1417_v49, %v1409_v57  ;;  %v1273_v49 = vpop.f32.mrf.mxu3 }
 0x13f   : > { %v1264_v0 = vadd.f32 %v1263_v19, %v1230_v61  ;;  %vm1359_vm9 = vcmp.lt.s32.totalorder %v1348_v55, %v2499_v26 }
 0x141   : > { %v1298_v4 = vadd.f32 %v1297_v53, %v1264_v0 }
 0x143   : > { %v1968_v6 = vpack.c.bf16 %v1298_v4, %v1296_v54  ;;  %v1385_v31 = vsel %vm1355_vm5, %v1298_v4, 0.0  ;;  %v1200_v15 = vpop.f32.mrf.mxu1  ;;  %v1302_v16 = vpop.f32.mrf.mxu0  ;;  %v1349_v4 = vadd.s32 64, %v2497_v25 }
 0x144   : > { %v1394_v50 = vadd.f32 %v1393_v37, %v1385_v31  ;;  %v1410_v8 = vmul.f32 %v1385_v31, %v1385_v31  ;;  %v1232_v9 = vpop.f32.mrf.mxu2  ;;  %v1201_v17 = vadd.f32 %v1200_v15, %v2481_v48 }
 0x145   : > { %1985 = vst [vmem:[%s2510_s13 + $0x8] sm:$0xff] %v1968_v6   ;;  %v1233_v62 = vadd.f32 %v1232_v9, %v1199_v5  ;;  %vm1360_vm10 = vcmp.lt.s32.totalorder %v1349_v4, %v2499_v26 }
 0x146   : > { %v1419_v11 = vadd.f32 %v1418_v44, %v1410_v8  ;;  %v1276_v1 = vpop.f32.mrf.mxu3 }
 0x147   : > { %v1267_v13 = vadd.f32 %v1266_v60, %v1233_v62 }
 0x149   : > { %v1301_v52 = vadd.f32 %v1300_v3, %v1267_v13  ;;  %v1350_v13 = vadd.s32 72, %v2497_v25 }
 0x14b   : > { %v1386_v38 = vsel %vm1356_vm6, %v1301_v52, 0.0  ;;  %v1203_v33 = vpop.f32.mrf.mxu1  ;;  %v1305_v36 = vpop.f32.mrf.mxu0  ;;  %vm1361_vm11 = vcmp.lt.s32.totalorder %v1350_v13, %v2499_v26 }
 0x14c   : > { %v1395_v18 = vadd.f32 %v1394_v50, %v1386_v38  ;;  %v1411_v21 = vmul.f32 %v1386_v38, %v1386_v38  ;;  %v1234_v23 = vpop.f32.mrf.mxu2  ;;  %v1204_v35 = vadd.f32 %v1203_v33, %v2484_v20 }
 0x14d   : > { %v1235_v28 = vadd.f32 %v1234_v23, %v1201_v17 }
 0x14e   : > { %v1420_v2 = vadd.f32 %v1419_v11, %v1411_v21 }
 0x14f   : > { %v1269_v29 = vadd.f32 %v1268_v46, %v1235_v28 }
 0x151   : > { %v1303_v34 = vadd.f32 %v1302_v16, %v1269_v29 }
 0x153   : > { %v1973_v12 = vpack.c.bf16 %v1303_v34, %v1301_v52  ;;  %v1387_v48 = vsel %vm1357_vm7, %v1303_v34, 0.0  ;;  %v1205_v39 = vpop.f32.mrf.mxu1  ;;  %v1307_v53 = vpop.f32.mrf.mxu0 }
 0x154   : > { %v1396_v27 = vadd.f32 %v1395_v18, %v1387_v48  ;;  %v1412_v19 = vmul.f32 %v1387_v48, %v1387_v48  ;;  %v1237_v40 = vpop.f32.mrf.mxu2  ;;  %v1206_v32 = vadd.f32 %v1205_v39, %v2487_v63  ;;  %v1278_v52 = vpop.f32.mrf.mxu3 }
 0x155   : > { %1986 = vst [vmem:[%s2510_s13 + $0x10] sm:$0xff] %v1973_v12   ;;  %v1238_v42 = vadd.f32 %v1237_v40, %v1204_v35 }
 0x156   : > { %v1421_v43 = vadd.f32 %v1420_v2, %v1412_v19 }
 0x157   : > { %v1272_v45 = vadd.f32 %v1271_v30, %v1238_v42 }
 0x159   : > { %v1306_v47 = vadd.f32 %v1305_v36, %v1272_v45 }
 0x15b   : > { %v1388_v20 = vsel %vm1358_vm8, %v1306_v47, 0.0  ;;  %v1208_v58 = vpop.f32.mrf.mxu1  ;;  %v1310_v31 = vpop.f32.mrf.mxu0 }
 0x15c   : > { %v1397_v51 = vadd.f32 %v1396_v27, %v1388_v20  ;;  %v1413_v22 = vmul.f32 %v1388_v20, %v1388_v20  ;;  %v1239_v54 = vpop.f32.mrf.mxu2  ;;  %v1209_v60 = vadd.f32 %v1208_v58, %v2491_v7 }
 0x15d   : > { %v1240_v56 = vadd.f32 %v1239_v54, %v1206_v32 }
 0x15e   : > { %v1422_v37 = vadd.f32 %v1421_v43, %v1413_v22 }
 0x15f   : > { %v1274_v57 = vadd.f32 %v1273_v49, %v1240_v56 }
 0x161   : > { %v1308_v59 = vadd.f32 %v1307_v53, %v1274_v57 }
 0x163   : > { %v1978_v61 = vpack.c.bf16 %v1308_v59, %v1306_v47  ;;  %v1389_v63 = vsel %vm1359_vm9, %v1308_v59, 0.0  ;;  %v1210_v8 = vpop.f32.mrf.mxu1  ;;  %v1312_v38 = vpop.f32.mrf.mxu0 }
 0x164   : > { %v1398_v44 = vadd.f32 %v1397_v51, %v1389_v63  ;;  %v1414_v0 = vmul.f32 %v1389_v63, %v1389_v63  ;;  %v1242_v3 = vpop.f32.mrf.mxu2  ;;  %v1211_v10 = vadd.f32 %v1210_v8, %v2494_v14 }
 0x165   : > { %1987 = vst [vmem:[%s2510_s13 + $0x18] sm:$0xff] %v1978_v61   ;;  %v1243_v5 = vadd.f32 %v1242_v3, %v1209_v60 }
 0x166   : > { %v1423_v6 = vadd.f32 %v1422_v37, %v1414_v0 }
 0x167   : > { %v1277_v50 = vadd.f32 %v1276_v1, %v1243_v5 }
 0x169   : > { %v1311_v9 = vadd.f32 %v1310_v31, %v1277_v50 }
 0x16b   : > { %v1390_v7 = vsel %vm1360_vm10, %v1311_v9, 0.0 }
 0x16c   : > { %v1399_v62 = vadd.f32 %v1398_v44, %v1390_v7  ;;  %v1415_v11 = vmul.f32 %v1390_v7, %v1390_v7  ;;  %v1244_v46 = vpop.f32.mrf.mxu2 }
 0x16d   : > { %v1245_v15 = vadd.f32 %v1244_v46, %v1211_v10 }
 0x16e   : > { %v1424_v16 = vadd.f32 %v1423_v6, %v1415_v11 }
 0x16f   : > { %v1279_v17 = vadd.f32 %v1278_v52, %v1245_v15 }
 0x171   : > { %v1313_v18 = vadd.f32 %v1312_v38, %v1279_v17 }
 0x173   : > { %v1983_v21 = vpack.c.bf16 %v1313_v18, %v1311_v9  ;;  %v1391_v23 = vsel %vm1361_vm11, %v1313_v18, 0.0 }
 0x174   : > { %v1400_v24 = vadd.f32 %v1399_v62, %v1391_v23  ;;  %v1416_v14 = vmul.f32 %v1391_v23, %v1391_v23 }
 0x175   : > { %1988 = vst [vmem:[%s2510_s13 + $0x20] sm:$0xff] %v1983_v21  }
 0x176   : > { %v1401_v28 = vrot.slane %v1400_v24, 4  ;;  %v1425_v2 = vadd.f32 %v1424_v16, %v1416_v14 }
 0x178   : > { %v1402_v29 = vadd.f32 %v1401_v28, %v1400_v24  ;;  %v1426_v30 = vrot.slane %v1425_v2, 4 }
 0x17a   : > { %v1403_v33 = vrot.slane %v1402_v29, 2  ;;  %v1427_v25 = vadd.f32 %v1426_v30, %v1425_v2 }
 0x17c   : > { %v1404_v34 = vadd.f32 %v1403_v33, %v1402_v29  ;;  %v1428_v35 = vrot.slane %v1427_v25, 2 }
 0x17e   : > { %v1405_v36 = vrot.slane %v1404_v34, 1  ;;  %v1429_v12 = vadd.f32 %v1428_v35, %v1427_v25 }
 0x180   : > { %v1430_v48 = vrot.slane %v1429_v12, 1  ;;  %v1406_v26 = vadd.f32 %v1405_v36, %v1404_v34 }
 0x182   : > { %v1431_v27 = vadd.f32 %v1430_v48, %v1429_v12 }
 0x184   : > { %v1433_v19 = vsel %vm1432_vm12, %v1406_v26, %v1431_v27 }
 0x185   : > { %1434 = vst [vmem:[%s225_s22] sm:$0x3] %v1433_v19 }
 0x186 PF: > { %s14_s16 = sadd.s32 1, %s2085_s16   ;;  %s2563_s12 = smov %s2077_s14 }
 0x187   : > { %p11_p7 = scmp.ge.s32.totalorder %s14_s16, 10   ;;  %s2564_s13 = smov %s2081_s15 }
 0x188   : > { %s2565_s14 = smov %s2568_s17  ;;  %s2566_s15 = smov %s2572_s18 }
 0x189   :  { %13 = sbr.rel (!%p11_p7) target bundleno = 3 (0x3), region = 70 }

</bundles_post_ra>
